<compile_context>
chip_gen: v7x
topology: tpu7x:2x2x1
jax: 0.10.0
libtpu: 0.0.40
codegen_flags: <defaults>
</compile_context>

<pallas_src>
import functools
import math

import jax
import jax.numpy as jnp
from jax.experimental import pallas as pl
from jax.experimental.pallas import tpu as pltpu

_LANE = 128


def _res_convtranspose1d_kernel(xc_ref, xl_ref, xr_ref, w1t_ref, b1_ref,
                                w2p_ref, w20_ref, w2m_ref, b2_ref, o_ref, *,
                                dilation, res_scale, t_valid, padded):
    d = dilation
    i = pl.program_id(1)
    n_tiles = pl.num_programs(1)
    cdt = w1t_ref.dtype                          # MXU operand dtype (bf16/f32)

    x_c = xc_ref[0]                              # (n_state, TILE_T)
    tile_t = x_c.shape[1]
    halo_w = xl_ref.shape[-1]

    # conv1 (k=1 transposed conv == channel matmul) + ReLU on the aligned
    # centre tile -- no x_ext copy, f32 accumulation.
    h_c = jnp.dot(w1t_ref[...], x_c.astype(cdt),
                  preferred_element_type=jnp.float32) + b1_ref[...]
    h_c = jnp.maximum(h_c, 0.0)                  # (n_in, TILE_T) f32
    if padded:
        # Zero h on the padded tail (global t >= T); relu(b1) != 0 there.
        col = jax.lax.broadcasted_iota(jnp.int32, h_c.shape, 1) + i * tile_t
        h_c = jnp.where(col < t_valid, h_c, 0.0)
    h_c = h_c.astype(cdt)

    # Halo columns of x: last d cols of the left block, first d of the right.
    x_l = xl_ref[0][:, halo_w - d:]              # (n_state, d)
    x_r = xr_ref[0][:, :d]                       # (n_state, d)
    h_l = jnp.maximum(
        jnp.dot(w1t_ref[...], x_l.astype(cdt),
                preferred_element_type=jnp.float32) + b1_ref[...], 0.0)
    h_r = jnp.maximum(
        jnp.dot(w1t_ref[...], x_r.astype(cdt),
                preferred_element_type=jnp.float32) + b1_ref[...], 0.0)
    # h is zero outside [0, T): kill the left halo on the first tile (t < 0)
    # and the right halo on the last tile (t >= T; its block index was clamped
    # at the array edge).  Scalar-gated selects over (n_in, d) -- near free.
    h_l = jnp.where(i > 0, h_l, 0.0)
    h_r = jnp.where(i < n_tiles - 1, h_r, 0.0)
    if padded:
        col_r = (jax.lax.broadcasted_iota(jnp.int32, h_r.shape, 1)
                 + (i + 1) * tile_t)
        h_r = jnp.where(col_r < t_valid, h_r, 0.0)
    h_l = h_l.astype(cdt)
    h_r = h_r.astype(cdt)

    # Shifted views of h for the +d / -d taps (one lane-shifted copy each, in
    # the compute dtype).
    # TODO(synk): carry h_l in a VMEM scratch across time tiles (time axis
    # "arbitrary") to drop the left-halo DMA and its conv1 recompute entirely.
    h_plus = jnp.concatenate([h_c[:, d:], h_r], axis=1)            # h[t + d]
    h_minus = jnp.concatenate([h_l, h_c[:, :tile_t - d]], axis=1)  # h[t - d]

    # k=3 transposed conv: three accumulated MXU matmuls, f32 accumulation.
    y = jnp.dot(w2p_ref[...], h_plus, preferred_element_type=jnp.float32)
    y = y + jnp.dot(w20_ref[...], h_c, preferred_element_type=jnp.float32)
    y = y + jnp.dot(w2m_ref[...], h_minus, preferred_element_type=jnp.float32)
    y = jnp.maximum(y + b2_ref[...], 0.0)        # (n_state, TILE_T)

    o_ref[0] = (x_c.astype(jnp.float32) + res_scale * y).astype(o_ref.dtype)


def _vmem_capacity_bytes():
    """Best-effort VMEM capacity query (conservative v7x-sized fallback)."""
    try:
        info = pltpu.get_tpu_info()
        cap = getattr(info, "vmem_capacity_bytes", None)
        if cap:
            return int(cap)
    except Exception:
        pass
    return 64 * 1024 * 1024


def _choose_tiling(T_pad, halo_w, n_state, n_in, B, tile_t=None):
    """Pick the time-tile width: a multiple of halo_w that divides T_pad."""
    if tile_t is None:
        big_vmem = _vmem_capacity_bytes() >= 100 * 1024 * 1024
        # Per-step VMEM budget counts the double-buffered f32 in/out blocks
        # AND the in-kernel temporaries (bf16 x/h/h+-, f32 y + residual).
        budget = (20 if big_vmem else 8) * 1024 * 1024   # v5e/v6e wide, v7x tight
        cap = 8192 if big_vmem else 2048
        per_col = (4 * 4 * n_state                 # f32 in/out, double-buffered
                   + 2 * (n_state + 3 * n_in)      # bf16 x_c, h_c, h_plus, h_minus
                   + 8 * n_state)                  # f32 y + residual temporaries
        tile_t = min(cap, budget // per_col)
        if B == 1 and T_pad >= 2 * halo_w:
            tile_t = min(tile_t, T_pad // 2)       # keep >= 2 steps for megacore
    tile = max(halo_w, (int(tile_t) // halo_w) * halo_w)
    tile = min(tile, T_pad)
    while T_pad % tile != 0:                       # halo_w | T_pad -> terminates
        tile -= halo_w
    return tile


def res_convtranspose1d_block(x, w1, b1, w2, b2, *, dilation, res_scale,
                              tile_t=None, compute_dtype=jnp.bfloat16):
    """Forward pass of ResConvTranspose1DBlock.

    x : (B, n_state, T)    activations, PyTorch NCL layout (used as-is)
    w1: (n_state, n_in)    ConvTranspose1d(n_state, n_in, 1) weight (k squeezed)
    b1: (n_in,)
    w2: (n_in, n_state, 3) ConvTranspose1d(n_in, n_state, 3, pad=d, dil=d) weight
    b2: (n_state,)
    compute_dtype: MXU operand dtype (bf16 by default; accumulation always f32)
    """
    B, n_state, T = x.shape
    n_in = w1.shape[1]
    d = int(dilation)

    # Taps farther than the whole sequence contribute nothing: drop them via
    # zeroed tap weights and a dummy (tiny) shift so the tiling stays trivial.
    edge_taps = d < T
    d_k = d if edge_taps else 1
    halo_w = _LANE * ((d_k + _LANE - 1) // _LANE)  # halo block width (>= d_k)

    # Pad T up to a multiple of the halo block width (lane-unaligned T path);
    # the kernel masks h on the padded tail and the padded output columns are
    # sliced off below.
    T_pad = halo_w * ((T + halo_w - 1) // halo_w)
    padded = T_pad != T
    x_in = jnp.pad(x, ((0, 0), (0, 0), (0, T_pad - T))) if padded else x

    tile = _choose_tiling(T_pad, halo_w, n_state, n_in, B, tile_t)
    n_tiles = T_pad // tile
    r = tile // halo_w                             # halo blocks per time tile
    n_halo = T_pad // halo_w

    # Weight layouts for the NCL matmuls (tiny; done once in the wrapper).
    cdt = jnp.dtype(compute_dtype)
    w1t = jnp.transpose(w1, (1, 0)).astype(cdt)            # (n_in, n_state)
    b1r = b1.astype(jnp.float32).reshape(n_in, 1)
    w20 = jnp.transpose(w2[:, :, 1], (1, 0)).astype(cdt)   # centre tap
    if edge_taps:
        w2p = jnp.transpose(w2[:, :, 0], (1, 0)).astype(cdt)  # h[t + d] tap
        w2m = jnp.transpose(w2[:, :, 2], (1, 0)).astype(cdt)  # h[t - d] tap
    else:
        w2p = jnp.zeros((n_state, n_in), cdt)
        w2m = jnp.zeros((n_state, n_in), cdt)
    b2r = b2.astype(jnp.float32).reshape(n_state, 1)

    kernel = functools.partial(_res_convtranspose1d_kernel, dilation=d_k,
                               res_scale=res_scale, t_valid=T, padded=padded)

    big_vmem = _vmem_capacity_bytes() >= 100 * 1024 * 1024
    vmem_limit = (64 if big_vmem else 40) * 1024 * 1024

    out = pl.pallas_call(
        kernel,
        out_shape=jax.ShapeDtypeStruct((B, n_state, T_pad), x.dtype),
        grid_spec=pltpu.PrefetchScalarGridSpec(
            num_scalar_prefetch=0,
            grid=(B, n_tiles),
            in_specs=[
                # centre tile of x
                pl.BlockSpec((1, n_state, tile), lambda b, i: (b, 0, i)),
                # left / right halo blocks of x (indices clamped at the global
                # edges; the kernel zeroes the corresponding h there)
                pl.BlockSpec((1, n_state, halo_w),
                             lambda b, i: (b, 0, jnp.maximum(i * r - 1, 0))),
                pl.BlockSpec((1, n_state, halo_w),
                             lambda b, i: (b, 0, jnp.minimum((i + 1) * r,
                                                             n_halo - 1))),
                pl.BlockSpec((n_in, n_state), lambda b, i: (0, 0)),
                pl.BlockSpec((n_in, 1), lambda b, i: (0, 0)),
                pl.BlockSpec((n_state, n_in), lambda b, i: (0, 0)),
                pl.BlockSpec((n_state, n_in), lambda b, i: (0, 0)),
                pl.BlockSpec((n_state, n_in), lambda b, i: (0, 0)),
                pl.BlockSpec((n_state, 1), lambda b, i: (0, 0)),
            ],
            out_specs=pl.BlockSpec((1, n_state, tile), lambda b, i: (b, 0, i)),
        ),
        compiler_params=pltpu.CompilerParams(
            dimension_semantics=("parallel", "parallel"),
            vmem_limit_bytes=vmem_limit),
    )(x_in, x_in, x_in, w1t, b1r, w2p, w20, w2m, b2r)

    if padded:
        out = out[:, :, :T]
    return out


def ref_forward(x, w1, b1, w2, b2, dilation, res_scale):
    """Pure-JAX reference matching PyTorch ConvTranspose1d semantics (NCL)."""
    h = jnp.einsum('bct,cd->bdt', x, w1) + b1[None, :, None]
    h = jnp.maximum(h, 0.0)
    # Transposed conv (stride=1) == correlation with the flipped kernel.
    w2_flip = w2[:, :, ::-1]                      # (n_in, n_state, 3)
    w_oik = jnp.transpose(w2_flip, (1, 0, 2))     # (n_state, n_in, 3)
    y = jax.lax.conv_general_dilated(
        h, w_oik, window_strides=(1,), padding=[(dilation, dilation)],
        rhs_dilation=(dilation,), dimension_numbers=('NCH', 'OIH', 'NCH'))
    y = jnp.maximum(y + b2[None, :, None], 0.0)
    return x + res_scale * y


if __name__ == "__main__":
    def run_case(B, n_state, n_in, T, dilation, res_scale, tile_t,
                 compute_dtype, atol, rtol, bf16_inputs=False):
        key = jax.random.PRNGKey(0)
        kx, k1, k2, k3, k4 = jax.random.split(key, 5)
        x = jax.random.normal(kx, (B, n_state, T), jnp.float32)
        bound1 = 1.0 / math.sqrt(n_state * 1)
        w1 = jax.random.uniform(k1, (n_state, n_in), jnp.float32, -bound1, bound1)
        b1 = jax.random.uniform(k2, (n_in,), jnp.float32, -bound1, bound1)
        bound2 = 1.0 / math.sqrt(n_in * 3)
        w2 = jax.random.uniform(k3, (n_in, n_state, 3), jnp.float32, -bound2, bound2)
        b2 = jax.random.uniform(k4, (n_state,), jnp.float32, -bound2, bound2)
        if bf16_inputs:
            # Snap values to the bf16 grid so the f32 reference and the bf16
            # MXU path see identical inputs (isolates in-kernel rounding).
            x, w1, b1, w2, b2 = (a.astype(jnp.bfloat16).astype(jnp.float32)
                                 for a in (x, w1, b1, w2, b2))

        out = res_convtranspose1d_block(x, w1, b1, w2, b2, dilation=dilation,
                                        res_scale=res_scale, tile_t=tile_t,
                                        compute_dtype=compute_dtype)
        out = jax.block_until_ready(out)
        ref = ref_forward(x, w1, b1, w2, b2, dilation, res_scale)
        assert out.shape == ref.shape
        err = float(jnp.max(jnp.abs(out - ref)))
        assert jnp.allclose(out, ref, atol=atol, rtol=rtol), \
            f"mismatch (max abs err {err})"

    # Multi-tile path (2 time tiles, dilation-3 halos crossing tile borders),
    # f32 MXU operands for a tight check of the tiling / halo / boundary logic.
    run_case(B=2, n_state=64, n_in=32, T=512, dilation=3, res_scale=0.5,
             tile_t=256, compute_dtype=jnp.float32, atol=5e-5, rtol=5e-5)
    # Default (generation-aware) tiling with bf16 MXU operands (the fast path).
    run_case(B=2, n_state=32, n_in=16, T=384, dilation=5, res_scale=1.0,
             tile_t=None, compute_dtype=jnp.bfloat16, atol=5e-2, rtol=5e-2,
             bf16_inputs=True)
    # Lane-unaligned T -> pad-and-slice fallback with padded-tail masking.
    run_case(B=1, n_state=16, n_in=8, T=100, dilation=2, res_scale=1.0,
             tile_t=None, compute_dtype=jnp.float32, atol=5e-5, rtol=5e-5)

    print("KERNEL_OK")
</pallas_src>

<mosaic_0001>
module attributes {stable_mosaic.version = 11 : i64} {
  func.func @_res_convtranspose1d_kernel(%arg0: i32, %arg1: i32, %arg2: memref<1x64x256xf32, #tpu.memory_space<vmem>>, %arg3: memref<1x64x128xf32, #tpu.memory_space<vmem>>, %arg4: memref<1x64x128xf32, #tpu.memory_space<vmem>>, %arg5: memref<32x64xf32, #tpu.memory_space<vmem>>, %arg6: memref<32x1xf32, #tpu.memory_space<vmem>>, %arg7: memref<64x32xf32, #tpu.memory_space<vmem>>, %arg8: memref<64x32xf32, #tpu.memory_space<vmem>>, %arg9: memref<64x32xf32, #tpu.memory_space<vmem>>, %arg10: memref<64x1xf32, #tpu.memory_space<vmem>>, %arg11: memref<1x64x256xf32, #tpu.memory_space<vmem>>) attributes {dimension_semantics = [#tpu.dimension_semantics<parallel>, #tpu.dimension_semantics<parallel>], iteration_bounds = array<i64: 2, 2>, scalar_prefetch = 0 : i64, scratch_operands = 0 : i64, tpu.core_type = #tpu.core_type<tc>, window_params = [{transform_indices = @transform_0, window_bounds = array<i64: 1, 64, 256>}, {transform_indices = @transform_1, window_bounds = array<i64: 1, 64, 128>}, {transform_indices = @transform_2, window_bounds = array<i64: 1, 64, 128>}, {pipeline_mode = #tpu.pipeline_mode<synchronous>, transform_indices = @transform_3, window_bounds = array<i64: 32, 64>}, {pipeline_mode = #tpu.pipeline_mode<synchronous>, transform_indices = @transform_4, window_bounds = array<i64: 32, 1>}, {pipeline_mode = #tpu.pipeline_mode<synchronous>, transform_indices = @transform_5, window_bounds = array<i64: 64, 32>}, {pipeline_mode = #tpu.pipeline_mode<synchronous>, transform_indices = @transform_6, window_bounds = array<i64: 64, 32>}, {pipeline_mode = #tpu.pipeline_mode<synchronous>, transform_indices = @transform_7, window_bounds = array<i64: 64, 32>}, {pipeline_mode = #tpu.pipeline_mode<synchronous>, transform_indices = @transform_8, window_bounds = array<i64: 64, 1>}, {transform_indices = @transform_9, window_bounds = array<i64: 1, 64, 256>}]} {
    %c0 = arith.constant 0 : index
    %c0_0 = arith.constant 0 : index
    %c0_1 = arith.constant 0 : index
    %0 = vector.load %arg2[%c0, %c0_0, %c0_1] : memref<1x64x256xf32, #tpu.memory_space<vmem>>, vector<1x64x256xf32>
    %1 = vector.shape_cast %0 : vector<1x64x256xf32> to vector<64x256xf32>
    %c0_2 = arith.constant 0 : index
    %c0_3 = arith.constant 0 : index
    %2 = vector.load %arg5[%c0_2, %c0_3] : memref<32x64xf32, #tpu.memory_space<vmem>>, vector<32x64xf32>
    %cst = arith.constant dense<0.000000e+00> : vector<32x256xf32>
    %3 = tpu.matmul %2, %1, %cst {dimension_numbers = #tpu.dot_dimension_numbers<[1], [0], [0], [1], [0, 0, 1, 1], [], []>} : vector<32x64xf32>, vector<64x256xf32>, vector<32x256xf32> -> vector<32x256xf32>
    %c0_4 = arith.constant 0 : index
    %c0_5 = arith.constant 0 : index
    %4 = vector.load %arg6[%c0_4, %c0_5] : memref<32x1xf32, #tpu.memory_space<vmem>>, vector<32x1xf32>
    %5 = vector.broadcast %4 : vector<32x1xf32> to vector<32x256xf32>
    %6 = arith.addf %3, %5 : vector<32x256xf32>
    %cst_6 = arith.constant 0.000000e+00 : f32
    %7 = vector.broadcast %cst_6 : f32 to vector<32x256xf32>
    %8 = arith.maximumf %6, %7 : vector<32x256xf32>
    %c0_7 = arith.constant 0 : index
    %c0_8 = arith.constant 0 : index
    %c0_9 = arith.constant 0 : index
    %9 = vector.load %arg3[%c0_7, %c0_8, %c0_9] : memref<1x64x128xf32, #tpu.memory_space<vmem>>, vector<1x64x128xf32>
    %10 = vector.shape_cast %9 : vector<1x64x128xf32> to vector<64x128xf32>
    %11 = vector.extract_strided_slice %10 {offsets = [0, 125], sizes = [64, 3], strides = [1, 1]} : vector<64x128xf32> to vector<64x3xf32>
    %c0_10 = arith.constant 0 : index
    %c0_11 = arith.constant 0 : index
    %c0_12 = arith.constant 0 : index
    %12 = vector.load %arg4[%c0_10, %c0_11, %c0_12] : memref<1x64x128xf32, #tpu.memory_space<vmem>>, vector<1x64x128xf32>
    %13 = vector.shape_cast %12 : vector<1x64x128xf32> to vector<64x128xf32>
    %14 = vector.extract_strided_slice %13 {offsets = [0, 0], sizes = [64, 3], strides = [1, 1]} : vector<64x128xf32> to vector<64x3xf32>
    %c0_13 = arith.constant 0 : index
    %c0_14 = arith.constant 0 : index
    %15 = vector.load %arg5[%c0_13, %c0_14] : memref<32x64xf32, #tpu.memory_space<vmem>>, vector<32x64xf32>
    %cst_15 = arith.constant dense<0.000000e+00> : vector<32x3xf32>
    %16 = tpu.matmul %15, %11, %cst_15 {dimension_numbers = #tpu.dot_dimension_numbers<[1], [0], [0], [1], [0, 0, 1, 1], [], []>} : vector<32x64xf32>, vector<64x3xf32>, vector<32x3xf32> -> vector<32x3xf32>
    %c0_16 = arith.constant 0 : index
    %c0_17 = arith.constant 0 : index
    %17 = vector.load %arg6[%c0_16, %c0_17] : memref<32x1xf32, #tpu.memory_space<vmem>>, vector<32x1xf32>
    %18 = vector.broadcast %17 : vector<32x1xf32> to vector<32x3xf32>
    %19 = arith.addf %16, %18 : vector<32x3xf32>
    %cst_18 = arith.constant 0.000000e+00 : f32
    %20 = vector.broadcast %cst_18 : f32 to vector<32x3xf32>
    %21 = arith.maximumf %19, %20 : vector<32x3xf32>
    %c0_19 = arith.constant 0 : index
    %c0_20 = arith.constant 0 : index
    %22 = vector.load %arg5[%c0_19, %c0_20] : memref<32x64xf32, #tpu.memory_space<vmem>>, vector<32x64xf32>
    %cst_21 = arith.constant dense<0.000000e+00> : vector<32x3xf32>
    %23 = tpu.matmul %22, %14, %cst_21 {dimension_numbers = #tpu.dot_dimension_numbers<[1], [0], [0], [1], [0, 0, 1, 1], [], []>} : vector<32x64xf32>, vector<64x3xf32>, vector<32x3xf32> -> vector<32x3xf32>
    %c0_22 = arith.constant 0 : index
    %c0_23 = arith.constant 0 : index
    %24 = vector.load %arg6[%c0_22, %c0_23] : memref<32x1xf32, #tpu.memory_space<vmem>>, vector<32x1xf32>
    %25 = vector.broadcast %24 : vector<32x1xf32> to vector<32x3xf32>
    %26 = arith.addf %23, %25 : vector<32x3xf32>
    %cst_24 = arith.constant 0.000000e+00 : f32
    %27 = vector.broadcast %cst_24 : f32 to vector<32x3xf32>
    %28 = arith.maximumf %26, %27 : vector<32x3xf32>
    %c0_i32 = arith.constant 0 : i32
    %29 = arith.cmpi sgt, %arg1, %c0_i32 : i32
    %cst_25 = arith.constant 0.000000e+00 : f32
    %30 = vector.broadcast %cst_25 : f32 to vector<32x3xf32>
    %31 = arith.select %29, %21, %30 : vector<32x3xf32>
    %c1_i32 = arith.constant 1 : i32
    %32 = arith.cmpi slt, %arg1, %c1_i32 : i32
    %cst_26 = arith.constant 0.000000e+00 : f32
    %33 = vector.broadcast %cst_26 : f32 to vector<32x3xf32>
    %34 = arith.select %32, %28, %33 : vector<32x3xf32>
    %35 = vector.extract_strided_slice %8 {offsets = [0, 3], sizes = [32, 253], strides = [1, 1]} : vector<32x256xf32> to vector<32x253xf32>
    %36 = tpu.concatenate %35, %34 in 1 : vector<32x253xf32>, vector<32x3xf32> -> vector<32x256xf32>
    %37 = vector.extract_strided_slice %8 {offsets = [0, 0], sizes = [32, 253], strides = [1, 1]} : vector<32x256xf32> to vector<32x253xf32>
    %38 = tpu.concatenate %31, %37 in 1 : vector<32x3xf32>, vector<32x253xf32> -> vector<32x256xf32>
    %c0_27 = arith.constant 0 : index
    %c0_28 = arith.constant 0 : index
    %39 = vector.load %arg7[%c0_27, %c0_28] : memref<64x32xf32, #tpu.memory_space<vmem>>, vector<64x32xf32>
    %cst_29 = arith.constant dense<0.000000e+00> : vector<64x256xf32>
    %40 = tpu.matmul %39, %36, %cst_29 {dimension_numbers = #tpu.dot_dimension_numbers<[1], [0], [0], [1], [0, 0, 1, 1], [], []>} : vector<64x32xf32>, vector<32x256xf32>, vector<64x256xf32> -> vector<64x256xf32>
    %c0_30 = arith.constant 0 : index
    %c0_31 = arith.constant 0 : index
    %41 = vector.load %arg8[%c0_30, %c0_31] : memref<64x32xf32, #tpu.memory_space<vmem>>, vector<64x32xf32>
    %cst_32 = arith.constant dense<0.000000e+00> : vector<64x256xf32>
    %42 = tpu.matmul %41, %8, %cst_32 {dimension_numbers = #tpu.dot_dimension_numbers<[1], [0], [0], [1], [0, 0, 1, 1], [], []>} : vector<64x32xf32>, vector<32x256xf32>, vector<64x256xf32> -> vector<64x256xf32>
    %43 = arith.addf %40, %42 : vector<64x256xf32>
    %c0_33 = arith.constant 0 : index
    %c0_34 = arith.constant 0 : index
    %44 = vector.load %arg9[%c0_33, %c0_34] : memref<64x32xf32, #tpu.memory_space<vmem>>, vector<64x32xf32>
    %cst_35 = arith.constant dense<0.000000e+00> : vector<64x256xf32>
    %45 = tpu.matmul %44, %38, %cst_35 {dimension_numbers = #tpu.dot_dimension_numbers<[1], [0], [0], [1], [0, 0, 1, 1], [], []>} : vector<64x32xf32>, vector<32x256xf32>, vector<64x256xf32> -> vector<64x256xf32>
    %46 = arith.addf %43, %45 : vector<64x256xf32>
    %c0_36 = arith.constant 0 : index
    %c0_37 = arith.constant 0 : index
    %47 = vector.load %arg10[%c0_36, %c0_37] : memref<64x1xf32, #tpu.memory_space<vmem>>, vector<64x1xf32>
    %48 = vector.broadcast %47 : vector<64x1xf32> to vector<64x256xf32>
    %49 = arith.addf %46, %48 : vector<64x256xf32>
    %cst_38 = arith.constant 0.000000e+00 : f32
    %50 = vector.broadcast %cst_38 : f32 to vector<64x256xf32>
    %51 = arith.maximumf %49, %50 : vector<64x256xf32>
    %cst_39 = arith.constant 5.000000e-01 : f32
    %52 = vector.broadcast %cst_39 : f32 to vector<64x256xf32>
    %53 = arith.mulf %52, %51 : vector<64x256xf32>
    %54 = arith.addf %1, %53 : vector<64x256xf32>
    %c0_40 = arith.constant 0 : index
    %c0_41 = arith.constant 0 : index
    %c0_42 = arith.constant 0 : index
    %55 = vector.load %arg11[%c0_40, %c0_41, %c0_42] : memref<1x64x256xf32, #tpu.memory_space<vmem>>, vector<1x64x256xf32>
    %56 = vector.shape_cast %55 : vector<1x64x256xf32> to vector<64x256xf32>
    %57 = vector.shape_cast %54 : vector<64x256xf32> to vector<1x64x256xf32>
    tpu.vector_store %arg11[%c0_40, %c0_41, %c0_42], %57 {strides = array<i32>} : memref<1x64x256xf32, #tpu.memory_space<vmem>>, vector<1x64x256xf32>,
    return
  }
  func.func @transform_0(%arg0: i32, %arg1: i32) -> (i32, i32, i32) {
    %c0_i32 = arith.constant 0 : i32
    %c0_i32_0 = arith.constant 0 : i32
    return %arg0, %c0_i32, %arg1 : i32, i32, i32
  }
  func.func @transform_1(%arg0: i32, %arg1: i32) -> (i32, i32, i32) {
    %c2_i32 = arith.constant 2 : i32
    %0 = arith.muli %arg1, %c2_i32 : i32
    %c1_i32 = arith.constant 1 : i32
    %1 = arith.subi %0, %c1_i32 : i32
    %c0_i32 = arith.constant 0 : i32
    %2 = arith.maxsi %1, %c0_i32 : i32
    %c0_i32_0 = arith.constant 0 : i32
    %c0_i32_1 = arith.constant 0 : i32
    return %arg0, %c0_i32_0, %2 : i32, i32, i32
  }
  func.func @transform_2(%arg0: i32, %arg1: i32) -> (i32, i32, i32) {
    %c1_i32 = arith.constant 1 : i32
    %0 = arith.addi %arg1, %c1_i32 : i32
    %c2_i32 = arith.constant 2 : i32
    %1 = arith.muli %0, %c2_i32 : i32
    %c3_i32 = arith.constant 3 : i32
    %2 = arith.minsi %1, %c3_i32 : i32
    %c0_i32 = arith.constant 0 : i32
    %c0_i32_0 = arith.constant 0 : i32
    return %arg0, %c0_i32, %2 : i32, i32, i32
  }
  func.func @transform_3(%arg0: i32, %arg1: i32) -> (i32, i32) {
    %c0_i32 = arith.constant 0 : i32
    %c0_i32_0 = arith.constant 0 : i32
    %c0_i32_1 = arith.constant 0 : i32
    return %c0_i32, %c0_i32_0 : i32, i32
  }
  func.func @transform_4(%arg0: i32, %arg1: i32) -> (i32, i32) {
    %c0_i32 = arith.constant 0 : i32
    %c0_i32_0 = arith.constant 0 : i32
    %c0_i32_1 = arith.constant 0 : i32
    return %c0_i32, %c0_i32_0 : i32, i32
  }
  func.func @transform_5(%arg0: i32, %arg1: i32) -> (i32, i32) {
    %c0_i32 = arith.constant 0 : i32
    %c0_i32_0 = arith.constant 0 : i32
    %c0_i32_1 = arith.constant 0 : i32
    return %c0_i32, %c0_i32_0 : i32, i32
  }
  func.func @transform_6(%arg0: i32, %arg1: i32) -> (i32, i32) {
    %c0_i32 = arith.constant 0 : i32
    %c0_i32_0 = arith.constant 0 : i32
    %c0_i32_1 = arith.constant 0 : i32
    return %c0_i32, %c0_i32_0 : i32, i32
  }
  func.func @transform_7(%arg0: i32, %arg1: i32) -> (i32, i32) {
    %c0_i32 = arith.constant 0 : i32
    %c0_i32_0 = arith.constant 0 : i32
    %c0_i32_1 = arith.constant 0 : i32
    return %c0_i32, %c0_i32_0 : i32, i32
  }
  func.func @transform_8(%arg0: i32, %arg1: i32) -> (i32, i32) {
    %c0_i32 = arith.constant 0 : i32
    %c0_i32_0 = arith.constant 0 : i32
    %c0_i32_1 = arith.constant 0 : i32
    return %c0_i32, %c0_i32_0 : i32, i32
  }
  func.func @transform_9(%arg0: i32, %arg1: i32) -> (i32, i32, i32) {
    %c0_i32 = arith.constant 0 : i32
    %c0_i32_0 = arith.constant 0 : i32
    return %arg0, %c0_i32, %arg1 : i32, i32, i32
  }
}

</mosaic_0001>

<bundles_post_ra>
// kernel: tpu_custom_call.1
= control target key start
LH: loop header
LB: loop body
LE: loop exit
PB: predicated region body
PF: predicated region fallthrough
CT: control target
= control target key end

     0   :  { %s3352_s0 = inlined_call_operand.hbm [shape: f32[2,64,512], index: 0, kind: input, shape index: {}]   ;;  %s3353_s1 = inlined_call_operand.hbm [shape: f32[2,64,512], index: 1, kind: input, shape index: {}]   ;;  %s3354_s2 = inlined_call_operand.hbm [shape: f32[2,64,512], index: 2, kind: input, shape index: {}]   ;;  %s3355_s3 = inlined_call_operand.vmem [shape: f32[32,64], index: 3, kind: input, shape index: {}]   ;;  %s3356_s4 = inlined_call_operand.vmem [shape: f32[32,1], index: 4, kind: input, shape index: {}]   ;;  %s3357_s5 = inlined_call_operand.vmem [shape: f32[64,32], index: 5, kind: input, shape index: {}]   ;;  %s3358_s6 = inlined_call_operand.vmem [shape: f32[64,32], index: 6, kind: input, shape index: {}]   ;;  %s3359_s7 = inlined_call_operand.vmem [shape: f32[64,32], index: 7, kind: input, shape index: {}]   ;;  %s3360_s8 = inlined_call_operand.vmem [shape: f32[64,1], index: 8, kind: input, shape index: {}]   ;;  %s3361_s9 = inlined_call_operand.hbm [shape: f32[2,64,512], index: 9, kind: output, shape index: {}]  }
   0x1   :  { %3387 = sst [smem:[#allocation23_spill]] %s3352_s0 }
   0x2   :  { %3388 = sst [smem:[#allocation24_spill]] %s3353_s1 }
   0x3   :  { %3389 = sst [smem:[#allocation25_spill]] %s3355_s3 }
   0x4   :  { %3390 = sst [smem:[#allocation26_spill]] %s3356_s4 }
   0x5   :  { %3391 = sst [smem:[#allocation27_spill]] %s3357_s5 }
   0x6   :  { %3392 = sst [smem:[#allocation28_spill]] %s3358_s6 }
   0x7   :  { %3393 = sst [smem:[#allocation29_spill]] %s3359_s7 }
   0x8   :  { %3394 = sst [smem:[#allocation30_spill]] %s3360_s8 }
   0x9   :  { %3395 = sst [smem:[#allocation31_spill]] %s3361_s9 }
   0xa   :  { %14 = vsyncpa [#allocation3], 0 }
   0xb   :  { %16 = vsyncpa [#allocation3 + $0x1], 0 }
   0xc   :  { %17 = vsyncpa [#allocation6], 0 }
   0xd   :  { %19 = vsyncpa [#allocation6 + $0x1], 0 }
   0xe   :  { %20 = vsyncpa [#allocation4], 0 }
   0xf   :  { %22 = vsyncpa [#allocation4 + $0x1], 0  ;;  %s2489_s30 = smov 0   ;;  %s2491_s10 = smov 0  }
  0x10   :  { %s2493_s11 = smov 0   ;;  %s2495_s12 = smov 0  }
  0x11   :  { %s2497_s13 = smov 0   ;;  %s2499_s14 = smov 0  }
  0x12   :  { %s2501_s15 = smov 0   ;;  %s2503_s16 = smov 0  }
  0x13   :  { %s2505_s17 = smov 0   ;;  %s2507_s18 = smov 0  }
  0x14   :  { %s2509_s19 = smov 0   ;;  %s2511_s20 = smov 0  }
  0x15   :  { %s2513_s21 = smov 0   ;;  %s2515_s22 = smov 0  }
  0x16 LB: > { %3396 = sst [smem:[#allocation13_spill]] %s2385_s13  ;;  %s2560_s23 = sadd.s32 4294967295, %s2421_s22   ;;  %s2421_s22 = sphi %s2515_s22, %s28_s22   ;;  %s2417_s21 = sphi %s2513_s21, %s3469_s21   ;;  %s2413_s20 = sphi %s2511_s20, %s3468_s20   ;;  %s2409_s19 = sphi %s2509_s19, %s3456_s19   ;;  %s2405_s18 = sphi %s2507_s18, %s3467_s18   ;;  %s2401_s17 = sphi %s2505_s17, %s3454_s17   ;;  %s2397_s16 = sphi %s2503_s16, %s3466_s16   ;;  %s2393_s15 = sphi %s2501_s15, %s3465_s15   ;;  %s2389_s14 = sphi %s2499_s14, %s3464_s14   ;;  %s2385_s13 = sphi %s2497_s13, %s3463_s13   ;;  %s2381_s12 = sphi %s2495_s12, %s3451_s12   ;;  %s2377_s11 = sphi %s2493_s11, %s3462_s11   ;;  %s2373_s10 = sphi %s2491_s10, %s3461_s10   ;;  %s2369_s30 = sphi %s2489_s30, %s3460_s30  }
  0x17   : > { %3397 = sst [smem:[#allocation14_spill]] %s2401_s17  ;;  %s37_s24 = sadd.s32 1, %s2413_s20 }
  0x18   : > { %3398 = sst [smem:[#allocation15_spill]] %s2405_s18  ;;  %p38_p0 = scmp.ge.s32.totalorder %s37_s24, 2 }
  0x19   : > { %3399 = sst [smem:[#allocation16_spill]] %s2409_s19  ;;  %s40_s25 = sadd.s32 1, %s2417_s21 }
  0x1a   : > { %3400 = sst [smem:[#allocation17_spill]] %s2413_s20  ;;  %p3377_p1 = scmp.eq.s32.totalorder %s2421_s22, 0 }
  0x1b   : > { %3401 = sst [smem:[#allocation18_spill]] %s2417_s21  ;;  %p3376_p2 = scmp.eq.s32.totalorder %s2560_s23, 0 }
  0x1c   : > { %s3471_s24 = smov (%p38_p0, %s37_s24), 0  ;;  %s3473_s25 = smov (!%p38_p0, %s40_s25), %s2417_s21 }
  0x1d   : > { %3402 = sst [smem:[#allocation19_spill]] %s3471_s24  ;;  %s45_s26 = ssub.s32 %s2413_s20, %s3471_s24 }
  0x1e   : > { %s2572_s27 = sshll.u32 %s2413_s20, 1  ;;  %p42_p3 = scmp.ge.s32.totalorder %s3473_s25, 2 }
  0x1f   : > { %s1708_s28 = sadd.s32 4294967295, %s2572_s27  ;;  %s1709_s29 = sshll.u32 %s3471_s24, 1 }
  0x20   : > { %p74_p4 = scmp.gt.s32.totalorder %s1708_s28, 0  ;;  %s3475_s25 = smov (%p42_p3, %s3473_s25), 0 }
  0x21   : > { %3403 = sst [smem:[#allocation20_spill]] %s3475_s25  ;;  %s2580_s9 = ssub.s32 %s2417_s21, %s3475_s25 }
  0x22   : > { %s3477_s28 = smov (!%p74_p4, %s1708_s28), 0  ;;  %s1710_s19 = sadd.s32 4294967295, %s1709_s29 }
  0x23   : > { %s2583_s20 = sor.u32 %s45_s26, %s2580_s9  ;;  %p78_p5 = scmp.gt.s32.totalorder %s1710_s19, 0 }
  0x24   : > { %s85_s24 = sadd.s32 1, %s2389_s14  ;;  %p92_p7 = scmp.ne.s32.totalorder %s2389_s14, %s2385_s13 }
  0x25   : > { %s3479_s19 = smov (!%p78_p5, %s1710_s19), 0  ;;  %p98_p8 = scmp.ne.s32.totalorder %s2385_s13, %s2381_s12 }
  0x26   : > { %s81_s7 = ssub.s32 %s3477_s28, %s3479_s19  ;;  %s2591_s25 = sadd.s32 2, %s1709_s29 }
  0x27   : > { %s82_s5 = sor.u32 %s81_s7, %s2580_s9  ;;  %p2596_p9 = por %p92_p7, %p3377_p1 }
  0x28   : > { %p83_p10 = scmp.eq.s32.totalorder %s82_s5, 0  ;;  %p2602_p11 = por %p98_p8, %p3376_p2 }
  0x29   : > { %p3375_p13 = scmp.lt.s32.totalorder %s2421_s22, 4  ;;  %s2612_s19 = sshll.u32 %s2417_s21, 5 }
  0x2a   : > { %s3405_s26 = scalar_select %p2602_p11, 1, 0 }
  0x2b   : > { %s2608_s12 = scalar_select %p83_p10, %s2389_s14, %s85_s24  }
  0x2c   : > { %s353_s7 = sand.u32 1, %s2421_s22   ;;  %s355_s29 = sand.u32 1, %s2389_s14  }
  0x2d   : > { %3406 = sst [smem:[#allocation21_spill]] %s2608_s12  ;;  %s1719_s6 = sshll.u32 %s355_s29, 6 }
  0x2e   : > { %s366_s18 = sadd.s32 %s2612_s19, %s3477_s28  ;;  %s3407_s1 = sld [smem:[#allocation24_spill]] }
  0x2f   : > { %s1723_s4 = sshll.u32 %s366_s18, 7  ;;  %s357_s24 = scalar_lea.vmem [#allocation5], %s1719_s6 }
  0x30   : > { %s369_s12 = sshll.u32 %s357_s24, 4  ;;  %p2628_p0 = pnand %p3375_p13, %p2596_p9  ;;  %s2622_s12 = int_to_ptr.vmem [resolvable:$true] %s369_s12 }
  0x31   : > { %s2633_s3 = scalar_lea.sflag [#allocation6], %s353_s7 }
  0x32   : > { %p2179_p5 = pneg %p2628_p0 }
  0x34   : > { %s2620_s13 = scalar_lea.hbm %s3407_s1, %s1723_s4  ;;  %s2182_s18 = scalar_lea.hbm %s3407_s1, 8192 }
  0x35   : > { %s2177_s4 = scalar_lea.hbm %s2620_s13, 1024  ;;  %p2183_p9 = scmp.lt.u32.totalorder %s2620_s13, %s3407_s1 }
  0x36   : > { %p2178_p4 = scmp.ne.s32.totalorder %s2620_s13, %s2177_s4  ;;  %p2184_p10 = scmp.lt.u32.totalorder %s2182_s18, %s2177_s4 }
  0x37   : > { %p2186_p13 = scmp.lt.u32.totalorder %s2177_s4, %s2620_s13 }
  0x38   : > { %p2180_p7 = pnand %p2179_p5, %p2178_p4  ;;  %p2185_p12 = por %p2184_p10, %p2183_p9 }
  0x3a   : > { %p2181_p8 = pneg %p2180_p7  ;;  %p2187_p2 = por %p2186_p13, %p2185_p12 }
  0x3c   : > { %p2188_p1 = pnand %p2187_p2, %p2181_p8 }
  0x3e   : > { %2191 = shalt.err (!%p2188_p1)
}
  0x3f   : > { %s2192_s7 = scalar_lea.vmem %s2622_s12, 1024  ;;  %s2423_s5 = smov [#allocation5]  }
  0x40   : > { %p2193_p4 = scmp.ne.s32.totalorder %s2622_s12, %s2192_s7  ;;  %s2197_s24 = sshll.u32 %s2423_s5, 4  ;;  %s2198_s24 = int_to_ptr.vmem [resolvable:$false] %s2197_s24 }
  0x41   : > { %s2199_s6 = scalar_lea.vmem %s2198_s24, 2048  ;;  %p2200_p3 = scmp.lt.s32.totalorder %s2622_s12, %s2198_s24 }
  0x42   : > { %p2195_p7 = pnand %p2193_p4, %p2179_p5  ;;  %p2201_p9 = scmp.lt.s32.totalorder %s2199_s6, %s2192_s7 }
  0x44   : > { %p2196_p6 = pneg %p2195_p7  ;;  %p2202_p10 = por %p2201_p9, %p2200_p3 }
  0x46   : > { %p2203_p12 = pnand %p2202_p10, %p2196_p6 }
  0x48   : > { %2206 = shalt.err (!%p2203_p12)
}
  0x49   : > { %s3380_s4 = smov 512   ;;  %s3378_s8 = smov 128  }
  0x4a   : > { %s3379_s18 = smov 8   ;;  %p403_p1 = scmp.lt.s32.totalorder %s2421_s22, 5 }
  0x4b   : > { %1971 = dma.hbm_to_vmem [thread:$0]  (!%p2628_p0), %s2620_s13, 1024, %s2622_s12, %s2633_s3, %s3380_s4, %s3378_s8, %s3379_s18  }
  0x4c   : > { %p3409_p2 = scmp.ge.s32.totalorder %s2421_s22, 1  ;;  %s1706_s29 = sadd.s32 4294967294, %s2421_s22  }
  0x4d   : > { %s49_s7 = sadd.s32 1, %s2401_s17  ;;  %p3411_p13 = scmp.eq.s32.totalorder %s2583_s20, 0 }
  0x4e   : > { %p2667_p6 = pnand %p3409_p2, %p403_p1  ;;  %p56_p3 = scmp.ne.s32.totalorder %s2401_s17, %s2397_s16 }
  0x4f   : > { %s2676_s5 = scalar_select %p3411_p13, %s2401_s17, %s49_s7  }
  0x50   : > { %p62_p5 = scmp.ne.s32.totalorder %s2397_s16, %s2393_s15  ;;  %p286_p8 = scmp.eq.s32.totalorder %s2560_s23, 3 }
  0x51   : > { %3412 = sst [smem:[#allocation22_spill]] %s2676_s5  ;;  %p292_p4 = scmp.eq.s32.totalorder %s1706_s29, 3 }
  0x52   : > { %p3413_p7 = scmp.eq.s32.totalorder %s2421_s22, 0  ;;  %p3414_p10 = scmp.eq.s32.totalorder %s2560_s23, 0 }
  0x53   : > { %p2691_p12 = por %p286_p8, %p56_p3  ;;  %p2695_p1 = por %p292_p4, %p62_p5 }
  0x54   : > { %p58_p9 = por %p3413_p7, %p56_p3  ;;  %p2687_p0 = por %p3414_p10, %p62_p5 }
  0x55   : > { %s3416_s21 = scalar_select %p2691_p12, 1, 0 }
  0x56   : > { %s3415_s13 = scalar_select %p2687_p0, 1, 0 }
  0x57   : > { %s3417_s20 = scalar_select %p2695_p1, 1, 0 }
  0x58   : > { %s330_s12 = sand.u32 1, %s2401_s17   ;;  %s340_s24 = sadd.s32 %s2612_s19, %s2572_s27 }
  0x59   : > { %s1715_s6 = sshll.u32 %s330_s12, 7  ;;  %s1718_s7 = sshll.u32 %s340_s24, 7 }
  0x5a   : > { %s3418_s0 = sld [smem:[#allocation23_spill]]  ;;  %s334_s4 = scalar_lea.vmem [#allocation2], %s1715_s6 }
  0x5b   : > { %s343_s1 = sshll.u32 %s334_s4, 4  ;;  %p3419_p2 = scmp.lt.s32.totalorder %s2421_s22, 4  ;;  %s2707_s1 = int_to_ptr.vmem [resolvable:$true] %s343_s1 }
  0x5c   : > { %s2715_s24 = scalar_lea.sflag [#allocation3], %s330_s12 }
  0x5d   : > { %p2711_p13 = pnand %p3419_p2, %p58_p9 }
  0x5f   : > { %p2209_p5 = pneg %p2711_p13 }
  0x60   : > { %s2705_s18 = scalar_lea.hbm %s3418_s0, %s1718_s7  ;;  %s2212_s7 = scalar_lea.hbm %s3418_s0, 8192 }
  0x61   : > { %s2207_s8 = scalar_lea.hbm %s2705_s18, 2048  ;;  %p2213_p7 = scmp.lt.u32.totalorder %s2705_s18, %s3418_s0 }
  0x62   : > { %p2208_p3 = scmp.ne.s32.totalorder %s2705_s18, %s2207_s8  ;;  %p2214_p9 = scmp.lt.u32.totalorder %s2212_s7, %s2207_s8 }
  0x63   : > { %p2216_p2 = scmp.lt.u32.totalorder %s2207_s8, %s2705_s18 }
  0x64   : > { %p2210_p8 = pnand %p2209_p5, %p2208_p3  ;;  %p2215_p10 = por %p2214_p9, %p2213_p7 }
  0x66   : > { %p2211_p4 = pneg %p2210_p8  ;;  %p2217_p1 = por %p2216_p2, %p2215_p10 }
  0x68   : > { %p2218_p12 = pnand %p2217_p1, %p2211_p4 }
  0x6a   : > { %2221 = shalt.err (!%p2218_p12)
}
  0x6b   : > { %s2222_s12 = scalar_lea.vmem %s2707_s1, 2048  ;;  %s2427_s4 = smov [#allocation2]  }
  0x6c   : > { %p2223_p3 = scmp.ne.s32.totalorder %s2707_s1, %s2222_s12  ;;  %s2227_s6 = sshll.u32 %s2427_s4, 4  ;;  %s2228_s6 = int_to_ptr.vmem [resolvable:$false] %s2227_s6 }
  0x6d   : > { %s2229_s17 = scalar_lea.vmem %s2228_s6, 4096  ;;  %p2230_p0 = scmp.lt.s32.totalorder %s2707_s1, %s2228_s6 }
  0x6e   : > { %p2225_p8 = pnand %p2223_p3, %p2209_p5  ;;  %p2231_p7 = scmp.lt.s32.totalorder %s2229_s17, %s2222_s12 }
  0x70   : > { %p2226_p11 = pneg %p2225_p8  ;;  %p2232_p9 = por %p2231_p7, %p2230_p0 }
  0x72   : > { %p2233_p10 = pnand %p2232_p9, %p2226_p11 }
  0x74   : > { %2236 = shalt.err (!%p2233_p10)
}
  0x75   : > { %s2428_s8 = smov 256   ;;  %s2429_s7 = smov 16  }
  0x76   : > { %s3421_s29 = smov 512   ;;  %s1776_s12 = sadd.s32 2, %s2572_s27 }
  0x77   : > { %1968 = dma.hbm_to_vmem [thread:$0]  (!%p2711_p13), %s2705_s18, 2048, %s2707_s1, %s2715_s24, %s3421_s29, %s2428_s8, %s2429_s7  }
  0x78   : > { %p110_p11 = scmp.lt.s32.totalorder %s1776_s12, 3  ;;  %s121_s4 = sadd.s32 1, %s2377_s11 }
  0x79   : > { %p3422_p0 = scmp.lt.s32.totalorder %s2591_s25, 3  ;;  %p128_p12 = scmp.ne.s32.totalorder %s2377_s11, %s2373_s10 }
  0x7a   : > { %s3483_s12 = smov (!%p110_p11, %s1776_s12), 3  ;;  %p134_p1 = scmp.ne.s32.totalorder %s2373_s10, %s2369_s30 }
  0x7b   : > { %s3481_s25 = smov (!%p3422_p0, %s2591_s25), 3  ;;  %s381_s17 = sand.u32 1, %s2377_s11  }
  0x7c   : > { %s117_s6 = ssub.s32 %s3483_s12, %s3481_s25  ;;  %p3423_p5 = scmp.eq.s32.totalorder %s2421_s22, 0 }
  0x7d   : > { %s118_s0 = sor.u32 %s117_s6, %s2580_s9  ;;  %p3424_p3 = scmp.eq.s32.totalorder %s2560_s23, 0 }
  0x7e   : > { %p130_p4 = por %p128_p12, %p3423_p5  ;;  %p119_p2 = scmp.eq.s32.totalorder %s118_s0, 0 }
  0x7f   : > { %p2759_p8 = por %p134_p1, %p3424_p3  ;;  %s1724_s1 = sshll.u32 %s381_s17, 6 }
  0x80   : > { %s392_s27 = sadd.s32 %s2612_s19, %s3483_s12  ;;  %s383_s0 = scalar_lea.vmem [#allocation7], %s1724_s1 }
  0x81   : > { %s3425_s5 = scalar_select %p2759_p8, 1, 0 }
  0x82   : > { %s2765_s18 = scalar_select %p119_p2, %s2377_s11, %s121_s4  }
  0x83   : > { %s1727_s24 = sshll.u32 %s392_s27, 7  ;;  %s395_s9 = sshll.u32 %s383_s0, 4  ;;  %s2772_s9 = int_to_ptr.vmem [resolvable:$true] %s395_s9 }
  0x84   : > { %s2770_s30 = scalar_lea.hbm %s3354_s2, %s1727_s24  ;;  %p3426_p13 = scmp.lt.s32.totalorder %s2421_s22, 4 }
  0x85   : > { %s2237_s19 = scalar_lea.hbm %s2770_s30, 1024  ;;  %s2242_s6 = scalar_lea.hbm %s3354_s2, 8192 }
  0x86   : > { %p2776_p7 = pnand %p3426_p13, %p130_p4  ;;  %p2238_p9 = scmp.ne.s32.totalorder %s2770_s30, %s2237_s19 }
  0x87   : > { %p2243_p12 = scmp.lt.u32.totalorder %s2770_s30, %s3354_s2  ;;  %p2244_p1 = scmp.lt.u32.totalorder %s2242_s6, %s2237_s19 }
  0x88   : > { %p2239_p10 = pneg %p2776_p7  ;;  %p2246_p4 = scmp.lt.u32.totalorder %s2237_s19, %s2770_s30 }
  0x89   : > { %p2245_p5 = por %p2244_p1, %p2243_p12 }
  0x8a   : > { %p2240_p11 = pnand %p2239_p10, %p2238_p9 }
  0x8b   : > { %p2247_p2 = por %p2246_p4, %p2245_p5 }
  0x8c   : > { %p2241_p0 = pneg %p2240_p11 }
  0x8e   : > { %p2248_p3 = pnand %p2247_p2, %p2241_p0 }
  0x90   : > { %2251 = shalt.err (!%p2248_p3)
}
  0x91   : > { %s2252_s27 = scalar_lea.vmem %s2772_s9, 1024  ;;  %s2430_s24 = smov [#allocation7]  }
  0x92   : > { %p2253_p13 = scmp.ne.s32.totalorder %s2772_s9, %s2252_s27  ;;  %s2257_s8 = sshll.u32 %s2430_s24, 4  ;;  %s2258_s8 = int_to_ptr.vmem [resolvable:$false] %s2257_s8 }
  0x93   : > { %s2259_s7 = scalar_lea.vmem %s2258_s8, 2048  ;;  %p2260_p8 = scmp.lt.s32.totalorder %s2772_s9, %s2258_s8 }
  0x94   : > { %p2255_p9 = pnand %p2253_p13, %p2239_p10  ;;  %p2261_p12 = scmp.lt.s32.totalorder %s2259_s7, %s2252_s27 }
  0x96   : > { %p2256_p11 = pneg %p2255_p9  ;;  %p2262_p1 = por %p2261_p12, %p2260_p8 }
  0x98   : > { %p2263_p5 = pnand %p2262_p1, %p2256_p11 }
  0x9a   : > { %2266 = shalt.err (!%p2263_p5)
}
  0x9b   : > { %s3428_s0 = smov 8   ;;  %s3429_s19 = smov 128  }
  0x9c   : > { %1974 = dma.hbm_to_vmem [thread:$0]  (!%p2776_p7), %s2770_s30, 1024, %s2772_s9, %s2633_s3, %s3421_s29, %s3429_s19, %s3428_s0  }
  0x9d   : > { %407 = sbr.rel (%p2667_p6) target bundleno = 857 (0x359), region = 56  ;;  %s2812_s12 = sand.u32 (!%p2667_p6), 1, %s2397_s16  }
  0x9e   : > { %s1729_s4 = sshll.u32 (!%p2667_p6), %s2812_s12, 7  ;;  %s410_s6 = scalar_lea.sflag (!%p2667_p6), [#allocation3], %s2812_s12 }
  0x9f   : > { %s2818_s25 = scalar_lea.vmem (!%p2667_p6), [#allocation2], %s1729_s4  ;;  %p3430_p8 = scmp.ne.s32.totalorder (!%p2667_p6), %s3415_s13, 0 }
  0xa4   : > { %2352 = dma.done.wait (%p3430_p8), %s410_s6, 2048  }
  0xa5   : > { %2354 = vsyncadd (%p3430_p8), %s410_s6, 4294965248  ;;  %s3431_s3 = sld [smem:[#allocation13_spill]]  ;;  %s418_s28 = sand.u32 1, %s2560_s23  }
  0xa6   : > { %s419_s9 = scalar_lea.sflag [#allocation6], %s418_s28  ;;  %p3432_p6 = scmp.ne.s32.totalorder %s3405_s26, 0 }
  0xab   : > { %s420_s29 = sand.u32 1, %s3431_s3  }
  0xac   : > { %s1730_s30 = sshll.u32 %s420_s29, 6 }
  0xad   : > { %s2826_s17 = scalar_lea.vmem [#allocation5], %s1730_s30 }
  0xae   : > { %2356 = dma.done.wait (%p3432_p6), %s419_s9, 1024  }
  0xaf   : > { %2358 = vsyncadd (%p3432_p6), %s419_s9, 4294966272  ;;  %s429_s1 = sand.u32 1, %s2373_s10   ;;  %p3433_p7 = scmp.ne.s32.totalorder %s3425_s5, 0 }
  0xb0   : > { %s1731_s27 = sshll.u32 %s429_s1, 6 }
  0xb1   : > { %s2833_s13 = scalar_lea.vmem [#allocation7], %s1731_s27 }
  0xb2   : > { %2360 = dma.done.wait (%p3433_p7), %s419_s9, 1024  }
  0xb3   : > { %2362 = vsyncadd (%p3433_p7), %s419_s9, 4294966272  ;;  %v2431_v0 = vmov 0.0   ;;  %v2432_v1 = vmov 0   ;;  %v640_v2 = vld [vmem:[%s2826_s17] sm:$0xff]  ;;  %v641_v3 = vld [vmem:[%s2826_s17 + $0x8] sm:$0xff]  ;;  %s2433_s23 = smov 3  }
  0xb4   : > { %607 = vmatprep.mubr.f32.mxu0 %v2431_v0  ;;  %2125 = vset.pattern.permute.xlu0 %v2432_v1  ;;  %v2843_v4 = vld [vmem:[%s2818_s25 + $0x8] sm:$0xff]  ;;  %v2105_v5 = vpack.i.bf16 %v641_v3, %v640_v2  ;;  %v2846_v6 = vld [vmem:[%s2818_s25 + $0x18] sm:$0xff]  ;;  %v2849_v7 = vld [vmem:[%s2818_s25] sm:$0xff]  ;;  %s3434_s24 = sld [smem:[#allocation25_spill]]  ;;  %vm530_vm0 = vcmask 523264   ;;  %s3435_s0 = sld [smem:[#allocation26_spill]] }
  0xb5   : > { %2126 = vset.pattern.permute.xlu1 %v2432_v1  ;;  %v2852_v8 = vld [vmem:[%s2818_s25 + $0x10] sm:$0xff]  ;;  %v1849_v9 = vpack.c.bf16 %v2846_v6, %v2843_v4  ;;  %v643_v12 = vld [vmem:[%s2826_s17 + $0x18] sm:$0xff]  ;;  %v2861_v13 = vld [vmem:[%s2818_s25 + $0x28] sm:$0xff]  ;;  %s2434_s8 = smov 125   ;;  %s3439_s6 = sld [smem:[#allocation28_spill]]  ;;  %vm988_vm2 = vcmask 261120  }
  0xb6   : > { %v1851_v10 = vpack.c.bf16 %v2852_v8, %v2849_v7  ;;  %v642_v11 = vld [vmem:[%s2826_s17 + $0x10] sm:$0xff]  ;;  %2106 = vrot.lane.b32.xlu0 %v2105_v5, %s2433_s23  ;;  %v2865_v15 = vld [vmem:[%s2818_s25 + $0x38] sm:$0xff]  ;;  %v2868_v16 = vld [vmem:[%s2818_s25 + $0x20] sm:$0xff]  ;;  %vm906_vm3 = vcmask 1022976   ;;  %vm955_vm5 = vcmask 23552   ;;  %s3443_s9 = sld [smem:[#allocation27_spill]] }
  0xb7   : > { %v2110_v14 = vpack.i.bf16 %v643_v12, %v642_v11  ;;  %v2871_v17 = vld [vmem:[%s2818_s25 + $0x30] sm:$0xff]  ;;  %1850 = vmatprep.subr.bf16.mxu0 %v1849_v9  ;;  %v1853_v18 = vpack.c.bf16 %v2865_v15, %v2861_v13  ;;  %v644_v19 = vld [vmem:[%s2826_s17 + $0x20] sm:$0xff]  ;;  %v645_v20 = vld [vmem:[%s2826_s17 + $0x28] sm:$0xff]  ;;  %s3444_s26 = sld [smem:[#allocation29_spill]]  ;;  %s3226_s19 = scalar_lea.vmem [#allocation8], %s1729_s4 }
  0xb8   : > { %v2878_v21 = vld [vmem:[%s2818_s25 + $0x48] sm:$0xff]  ;;  %1852 = vmatpush1.bf16.msra.mxu0 %v1851_v10  ;;  %v1855_v22 = vpack.c.bf16 %v2871_v17, %v2868_v16  ;;  %v2115_v23 = vpack.i.bf16 %v645_v20, %v644_v19  ;;  %v2883_v24 = vld [vmem:[%s2818_s25 + $0x58] sm:$0xff]  ;;  %v2886_v25 = vld [vmem:[%s2818_s25 + $0x40] sm:$0xff]  ;;  %s3445_s4 = sld [smem:[#allocation16_spill]]  ;;  %p3448_p2 = scmp.ne.s32.totalorder %s3416_s21, 0 }
  0xb9   : > { %1854 = vmatprep.subr.bf16.mxu0 %v1853_v18  ;;  %v1857_v26 = vpack.c.bf16 %v2883_v24, %v2878_v21  ;;  %v2891_v27 = vld [vmem:[%s2818_s25 + $0x50] sm:$0xff]  ;;  %v647_v29 = vld [vmem:[%s2826_s17 + $0x38] sm:$0xff]  ;;  %v2898_v31 = vld [vmem:[%s2818_s25 + $0x68] sm:$0xff] }
  0xba   : > { %v646_v28 = vld [vmem:[%s2826_s17 + $0x30] sm:$0xff]  ;;  %2111 = vrot.lane.b32.xlu0 %v2110_v14, %s2433_s23  ;;  %2116 = vrot.lane.b32.xlu1 %v2115_v23, %s2433_s23  ;;  %v2901_v32 = vld [vmem:[%s2818_s25 + $0x78] sm:$0xff]  ;;  %v1859_v34 = vpack.c.bf16 %v2891_v27, %v2886_v25  ;;  %s3446_s17 = sld [smem:[#allocation31_spill]] }
  0xbb   : > { %v2120_v30 = vpack.i.bf16 %v647_v29, %v646_v28  ;;  %v502_v33 = vld [vmem:[%s3434_s24] sm:$0xff]  ;;  %v1861_v35 = vpack.c.bf16 %v2901_v32, %v2898_v31  ;;  %v2915_v37 = vld [vmem:[%s2818_s25 + $0x70] sm:$0xff]  ;;  %v649_v39 = vld [vmem:[%s2833_s13 + $0x8] sm:$0xff] }
  0xbc   : > { %1856 = vmatpush1.bf16.msra.mxu0 %v1855_v22  ;;  %1821 = vmatprep.mubr.msk.f32.mxu1 %vm530_vm0, %v502_v33  ;;  %v2912_v36 = vld [vmem:[%s2818_s25 + $0x60] sm:$0xff]  ;;  %v507_v41 = vld [vmem:[%s3435_s0 + $0x8] sm:$0xff]  ;;  %v509_v44 = vld [vmem:[%s3435_s0 + $0x18] sm:$0xff] }
  0xbd   : > { %1858 = vmatprep.subr.bf16.mxu0 %v1857_v26  ;;  %v648_v38 = vld [vmem:[%s2833_s13] sm:$0xff]  ;;  %v1863_v42 = vpack.c.bf16 %v2915_v37, %v2912_v36  ;;  %v650_v45 = vld [vmem:[%s2833_s13 + $0x10] sm:$0xff]  ;;  %v651_v46 = vld [vmem:[%s2833_s13 + $0x18] sm:$0xff] }
  0xbe   : > { %2121 = vrot.lane.b32.xlu1 %v2120_v30, %s2433_s23  ;;  %v506_v40 = vld [vmem:[%s3435_s0] sm:$0xff]  ;;  %v1881_v43 = vpack.c.bf16 %v649_v39, %v648_v38  ;;  %v508_v47 = vld [vmem:[%s3435_s0 + $0x10] sm:$0xff]  ;;  %v1885_v48 = vpack.c.bf16 %v651_v46, %v650_v45  ;;  %v653_v50 = vld [vmem:[%s2833_s13 + $0x28] sm:$0xff]  ;;  %s1771_s3 = sshll.u32 %s3445_s4, 5  ;;  %s2435_s4 = smov [#allocation8]  }
  0xbf   : > { %512 = vperm.xlu0 %2125, %v506_v40   ;;  %v652_v49 = vld [vmem:[%s2833_s13 + $0x20] sm:$0xff]  ;;  %v503_v51 = vld [vmem:[%s3434_s24 + $0x8] sm:$0xff]  ;;  %v654_v53 = vld [vmem:[%s2833_s13 + $0x30] sm:$0xff] }
  0xc0   : > { %1860 = vmatpush1.bf16.msra.mxu0 %v1859_v34  ;;  %v1889_v52 = vpack.c.bf16 %v653_v50, %v652_v49  ;;  %v655_v54 = vld [vmem:[%s2833_s13 + $0x38] sm:$0xff]  ;;  %v504_v55 = vld [vmem:[%s3434_s24 + $0x10] sm:$0xff]  ;;  %s3436_s13 = sld [smem:[#allocation15_spill]]  ;;  %s3447_s1 = smov %s3446_s17 }
  0xc1   : > { %1862 = vmatprep.subr.bf16.mxu0 %v1861_v35  ;;  %v1893_v56 = vpack.c.bf16 %v655_v54, %v654_v53  ;;  %v505_v57 = vld [vmem:[%s3434_s24 + $0x18] sm:$0xff] }
  0xc2   : > { %517 = vperm.xlu1 %2126, %v507_v41  }
  0xc3   : > { %527 = vperm.xlu0 %2125, %v509_v44  }
  0xc4   : > { %1864 = vmatpush1.bf16.msra.mxu0 %v1863_v42 }
  0xc5   : > { %1882 = vmatprep.subr.bf16.mxu0 %v1881_v43 }
  0xc6   : > { %522 = vperm.xlu1 %2126, %v508_v47   ;;  %p874_p10 = scmp.lt.s32.totalorder %s3436_s13, 1  ;;  %p866_p0 = scmp.gt.s32.totalorder %s3436_s13, 0 }
  0xc7   : > { %1733 = vmatmul.mubr.msk.f32.vlgmr.msra.gmra.mrb[0].mxu0 %vm530_vm0, %v502_v33  ;;  %s1770_s25 = sshll.u32 %s3436_s13, 1 }
  0xc8   : > { %1884 = vmatpush3.bf16.msra.mxu0 %v1881_v43  ;;  %613 = vmatprep.mubr.f32.mxu0 %v2431_v0  ;;  %s875_s5 = scalar_select %p874_p10, 1, 0 }
  0xc9   : > { %1886 = vmatprep.subr.bf16.mxu0 %v1885_v48  ;;  %s1565_s13 = sadd.s32 %s1771_s3, %s1770_s25  ;;  %s2271_s25 = sshll.u32 %s2435_s4, 4  ;;  %s2272_s25 = int_to_ptr.vmem [resolvable:$false] %s2271_s25 }
  0xca   : > { %s1772_s28 = sshll.u32 %s1565_s13, 7  ;;  %s2273_s3 = scalar_lea.vmem %s2272_s25, 4096 }
  0xcb   : > { %1734 = vmatmul.mubr.msk.f32.gmra.mrb[2].mxu0 %vm530_vm0, %v503_v51  ;;  %s3268_s27 = scalar_lea.hbm %s3446_s17, %s1772_s28 }
  0xcc   : > { %1888 = vmatpush3.bf16.msra.mxu0 %v1885_v48  ;;  %619 = vmatprep.mubr.f32.mxu0 %v2431_v0 }
  0xcd   : > { %1890 = vmatprep.subr.bf16.mxu0 %v1889_v52 }
  0xcf   : > { %1735 = vmatmul.mubr.msk.f32.gmra.mrb[4].mxu0 %vm530_vm0, %v504_v55 }
  0xd0   : > { %1892 = vmatpush3.bf16.msra.mxu0 %v1889_v52  ;;  %625 = vmatprep.mubr.f32.mxu0 %v2431_v0 }
  0xd1   : > { %1894 = vmatprep.subr.bf16.mxu0 %v1893_v56 }
  0xd3   : > { %1736 = vmatmul.mubr.msk.f32.gmra.mrb[6].mxu0 %vm530_vm0, %v505_v57 }
  0xd4   : > { %1896 = vmatpush3.bf16.msra.mxu0 %v1893_v56  ;;  %1843 = vmatprep.mubr.msk.f32.mxu0 %vm530_vm0, %v502_v33 }
  0xd7   : > { %1844 = vmatmul.mubr.msk.f32.vlgmr.msra.gmra.mrb[8].mxu0 %vm530_vm0, %v503_v51 }
  0xd8   : > { %1846 = vmatprep.mubr.msk.f32.mxu0 %vm530_vm0, %v504_v55 }
  0xdb   : > { %1847 = vmatmul.mubr.msk.f32.gmra.mrb[10].mxu0 %vm530_vm0, %v505_v57 }
  0xdc   : > { %1077 = vmatprep.mubr.f32.mxu0 %v2431_v0 }
 0x128   : > { %v2107_v58 = vpop.permute.xlu0 %2106 }
 0x129   : > { %v2109_v59 = vunpack.i.h.bf16 %v2107_v58  ;;  %v2108_v60 = vunpack.i.l.bf16 %v2107_v58 }
 0x12b   : > { %v1865_v61 = vpack.c.bf16 %v2109_v59, %v2108_v60  ;;  %v876_v59 = vstv %s875_s5  ;;  %s3440_s5 = sld [smem:[#allocation30_spill]] }
 0x12c   : > { %v2112_v62 = vpop.permute.xlu0 %2111  ;;  %v2117_v63 = vpop.permute.xlu1 %2116  ;;  %vm3005_vm1 = vcmp.eq.s32.totalorder %v876_v59, 1 }
 0x12d   : > { %v2114_v1 = vunpack.i.h.bf16 %v2112_v62  ;;  %v2113_v2 = vunpack.i.l.bf16 %v2112_v62  ;;  %1866 = vmatprep.subr.bf16.mxu1 %v1865_v61  ;;  %v2119_v3 = vunpack.i.h.bf16 %v2117_v63  ;;  %v2118_v5 = vunpack.i.l.bf16 %v2117_v63 }
 0x12e   : > { %1868 = vmatpush3.bf16.msra.mxu1 %v1865_v61 }
 0x12f   : > { %v1869_v9 = vpack.c.bf16 %v2114_v1, %v2113_v2  ;;  %v1873_v10 = vpack.c.bf16 %v2119_v3, %v2118_v5 }
 0x130   : > { %v2122_v11 = vpop.permute.xlu1 %2121 }
 0x131   : > { %1870 = vmatprep.subr.bf16.mxu1 %v1869_v9  ;;  %v2124_v12 = vunpack.i.h.bf16 %v2122_v11  ;;  %v2123_v14 = vunpack.i.l.bf16 %v2122_v11  ;;  %v1431_v59 = vld [vmem:[%s3440_s5 + $0x38] sm:$0xff] }
 0x132   : > { %1872 = vmatpush3.bf16.msra.mxu1 %v1869_v9 }
 0x133   : > { %v1877_v18 = vpack.c.bf16 %v2124_v12, %v2123_v14  ;;  %1874 = vmatprep.subr.bf16.mxu1 %v1873_v10 }
 0x136   : > { %1876 = vmatpush3.bf16.msra.mxu1 %v1873_v10 }
 0x137   : > { %1878 = vmatprep.subr.bf16.mxu1 %v1877_v18 }
 0x13a   : > { %1880 = vmatpush3.bf16.msra.mxu1 %v1877_v18 }
 0x13d   : > { %1822 = vmatmul.mubr.msk.f32.vlgmr.msra.gmra.mrb[0].mxu1 %vm530_vm0, %v503_v51 }
 0x13e   : > { %1824 = vmatprep.mubr.msk.f32.mxu1 %vm530_vm0, %v504_v55  ;;  %v2965_v19 = vpop.permute.xlu0 %512 }
 0x141   : > { %1825 = vmatmul.mubr.msk.f32.gmra.mrb[2].mxu1 %vm530_vm0, %v505_v57  ;;  %v2967_v22 = vpop.permute.xlu1 %517 }
 0x142   : > { %1226 = vmatprep.mubr.f32.mxu1 %v2431_v0  ;;  %v2992_v49 = vpop.permute.xlu0 %527 }
 0x145   : > { %v2977_v39 = vpop.permute.xlu1 %522 }
 0x19a   : > { %v609_v20 = vpop.f32.mrb[0].mxu0 }
 0x19b   : > { %v610_v23 = vadd.f32 %v609_v20, %v2965_v19  ;;  %v611_v26 = vpop.f32.mrb[1].mxu0 }
 0x19c   : > { %v612_v28 = vadd.f32 %v611_v26, %v2965_v19 }
 0x19d   : > { %v2971_v29 = vmax.f32 %v610_v23, 0.0 }
 0x19e   : > { %v2973_v30 = vmax.f32 %v612_v28, 0.0  ;;  %v615_v33 = vpop.f32.mrb[2].mxu0 }
 0x19f   : > { %v616_v34 = vadd.f32 %v615_v33, %v2967_v22  ;;  %v617_v35 = vpop.f32.mrb[3].mxu0 }
 0x1a0   : > { %v618_v38 = vadd.f32 %v617_v35, %v2967_v22  ;;  %v2157_v40 = vpack.i.bf16 %v2973_v30, %v2971_v29 }
 0x1a1   : > { %v2982_v41 = vmax.f32 %v616_v34, 0.0  ;;  %v980_v34 = vld [vmem:[%s3439_s6] sm:$0xff] }
 0x1a2   : > { %v2984_v42 = vmax.f32 %v618_v38, 0.0  ;;  %v621_v43 = vpop.f32.mrb[4].mxu0 }
 0x1a3   : > { %v1899_v44 = vpack.c.bf16 %v2982_v41, %v2971_v29  ;;  %v622_v45 = vadd.f32 %v621_v43, %v2977_v39  ;;  %v623_v46 = vpop.f32.mrb[5].mxu0  ;;  %v2127_v47 = vpack.i.bf16 %v2982_v41, %v2971_v29  ;;  %v1424_v29 = vld [vmem:[%s3440_s5] sm:$0xff] }
 0x1a4   : > { %v624_v48 = vadd.f32 %v623_v46, %v2977_v39  ;;  %v1897_v50 = vpack.c.bf16 %v2984_v42, %v2973_v30  ;;  %v2132_v51 = vpack.i.bf16 %v2984_v42, %v2973_v30  ;;  %v2162_v52 = vpack.i.bf16 %v2984_v42, %v2982_v41  ;;  %v985_v30 = vld [vmem:[%s3439_s6 + $0x28] sm:$0xff] }
 0x1a5   : > { %v636_v53 = vmax.f32 %v622_v45, 0.0  ;;  %2128 = vrot.lane.b32.xlu1 %v2127_v47, %s2434_s8  ;;  %v981_v45 = vld [vmem:[%s3439_s6 + $0x8] sm:$0xff] }
 0x1a6   : > { %v637_v54 = vmax.f32 %v624_v48, 0.0  ;;  %v627_v55 = vpop.f32.mrb[6].mxu0  ;;  %1898 = vmatprep.subr.bf16.mxu0 %v1897_v50  ;;  %v982_v48 = vld [vmem:[%s3439_s6 + $0x10] sm:$0xff]  ;;  %v983_v50 = vld [vmem:[%s3439_s6 + $0x18] sm:$0xff] }
 0x1a7   : > { %v628_v56 = vadd.f32 %v627_v55, %v2992_v49  ;;  %v629_v57 = vpop.f32.mrb[7].mxu0  ;;  %1900 = vmatpush1.bf16.msra.mxu0 %v1899_v44  ;;  %v1428_v55 = vld [vmem:[%s3440_s5 + $0x20] sm:$0xff] }
 0x1a8   : > { %v630_v58 = vadd.f32 %v629_v57, %v2992_v49  ;;  %v2167_v60 = vpack.i.bf16 %v637_v54, %v636_v53  ;;  %v1429_v57 = vld [vmem:[%s3440_s5 + $0x28] sm:$0xff] }
 0x1a9   : > { %v638_v61 = vmax.f32 %v628_v56, 0.0  ;;  %2133 = vrot.lane.b32.xlu1 %v2132_v51, %s2434_s8  ;;  %v984_v51 = vld [vmem:[%s3439_s6 + $0x20] sm:$0xff]  ;;  %v987_v56 = vld [vmem:[%s3439_s6 + $0x38] sm:$0xff] }
 0x1aa   : > { %v639_v62 = vmax.f32 %v630_v58, 0.0  ;;  %v1845_v63 = vpop.f32.mrb[8].mxu0  ;;  %v1430_v58 = vld [vmem:[%s3440_s5 + $0x30] sm:$0xff] }
 0x1ab   : > { %v1903_v1 = vpack.c.bf16 %v638_v61, %v636_v53  ;;  %v849_v2 = vadd.f32 %v1845_v63, %v2967_v22  ;;  %v843_v5 = vpop.f32.mrb[9].mxu0  ;;  %v2152_v9 = vpack.i.bf16 %v638_v61, %v636_v53  ;;  %v986_v53 = vld [vmem:[%s3439_s6 + $0x30] sm:$0xff] }
 0x1ac   : > { %v844_v10 = vadd.f32 %v843_v5, %v2965_v19  ;;  %v1901_v11 = vpack.c.bf16 %v639_v62, %v637_v54  ;;  %v2142_v12 = vpack.i.bf16 %v639_v62, %v637_v54  ;;  %v2172_v14 = vpack.i.bf16 %v639_v62, %v638_v61  ;;  %v1427_v54 = vld [vmem:[%s3440_s5 + $0x18] sm:$0xff] }
 0x1ad   : > { %v863_v18 = vmax.f32 %v849_v2, 0.0 }
 0x1ae   : > { %v862_v20 = vmax.f32 %v844_v10, 0.0  ;;  %v1848_v23 = vpop.f32.mrb[10].mxu0  ;;  %1902 = vmatprep.subr.bf16.mxu0 %v1901_v11 }
 0x1af   : > { %v879_v26 = vsel %vm3005_vm1, %v863_v18, 0.0  ;;  %v859_v28 = vadd.f32 %v1848_v23, %v2992_v49  ;;  %v853_v33 = vpop.f32.mrb[11].mxu0  ;;  %1904 = vmatpush1.bf16.msra.mxu0 %v1903_v1 }
 0x1b0   : > { %v878_v35 = vsel %vm3005_vm1, %v862_v20, 0.0  ;;  %v854_v38 = vadd.f32 %v853_v33, %v2977_v39 }
 0x1b1   : > { %v865_v41 = vmax.f32 %v859_v28, 0.0  ;;  %v2137_v42 = vpack.i.bf16 %v879_v26, %v878_v35 }
 0x1b2   : > { %v864_v43 = vmax.f32 %v854_v38, 0.0  ;;  %1745 = vmatmul.mubr.msk.f32.vlgmr.msra.gmra.mrb[12].mxu0 %vm988_vm2, %v980_v34 }
 0x1b3   : > { %v881_v44 = vsel %vm3005_vm1, %v865_v41, 0.0  ;;  %2138 = vrot.lane.b32.xlu0 %v2137_v42, %s2434_s8  ;;  %1083 = vmatprep.mubr.f32.mxu0 %v2431_v0 }
 0x1b4   : > { %v880_v46 = vsel %vm3005_vm1, %v864_v43, 0.0 }
 0x1b5   : > { %v2147_v47 = vpack.i.bf16 %v881_v44, %v880_v46 }
 0x1b6   : > { %1746 = vmatmul.mubr.msk.f32.gmra.mrb[14].mxu0 %vm988_vm2, %v981_v45 }
 0x1b7   : > { %2143 = vrot.lane.b32.xlu0 %v2142_v12, %s2434_s8  ;;  %2148 = vrot.lane.b32.xlu1 %v2147_v47, %s2434_s8 }
 0x1b8   : > { %1089 = vmatprep.mubr.f32.mxu0 %v2431_v0 }
 0x1ba   : > { %1747 = vmatmul.mubr.msk.f32.gmra.mrb[16].mxu0 %vm988_vm2, %v982_v48 }
 0x1bb   : > { %2153 = vrot.lane.b32.xlu0 %v2152_v9, %s2434_s8  ;;  %2158 = vrot.lane.b32.xlu1 %v2157_v40, %s2433_s23  ;;  %v1425_v40 = vld [vmem:[%s3440_s5 + $0x8] sm:$0xff]  ;;  %s1553_s8 = scalar_lea.sflag [#allocation4], %s2812_s12 }
 0x1bc   : > { %1095 = vmatprep.mubr.f32.mxu0 %v2431_v0 }
 0x1be   : > { %1748 = vmatmul.mubr.msk.f32.gmra.mrb[18].mxu0 %vm988_vm2, %v983_v50 }
 0x1bf   : > { %2163 = vrot.lane.b32.xlu0 %v2162_v52, %s2433_s23  ;;  %2168 = vrot.lane.b32.xlu1 %v2167_v60, %s2433_s23  ;;  %v1426_v52 = vld [vmem:[%s3440_s5 + $0x10] sm:$0xff] }
 0x1c0   : > { %1101 = vmatprep.mubr.f32.mxu0 %v2431_v0 }
 0x1c2   : > { %1749 = vmatmul.mubr.msk.f32.gmra.mrb[20].mxu0 %vm988_vm2, %v984_v51 }
 0x1c3   : > { %2173 = vrot.lane.b32.xlu0 %v2172_v14, %s2433_s23  ;;  %1434 = vperm.xlu1 %2126, %v1424_v29   ;;  %s867_s23 = scalar_select %p866_p0, 1, 0 }
 0x1c4   : > { %1107 = vmatprep.mubr.f32.mxu0 %v2431_v0 }
 0x1c5   : > { %v868_v46 = vstv %s867_s23  ;;  %s1568_s23 = sshll.u32 %s3226_s19, 4  ;;  %s3271_s23 = int_to_ptr.vmem [resolvable:$true] %s1568_s23 }
 0x1c6   : > { %1750 = vmatmul.mubr.msk.f32.gmra.mrb[22].mxu0 %vm988_vm2, %v985_v30  ;;  %vm3105_vm4 = vcmp.eq.s32.totalorder %v868_v46, 1  ;;  %s2267_s7 = scalar_lea.vmem %s3271_s23, 2048  ;;  %p2274_p9 = scmp.lt.s32.totalorder %s3271_s23, %s2272_s25 }
 0x1c7   : > { %1439 = vperm.xlu0 %2125, %v1425_v40   ;;  %1444 = vperm.xlu1 %2126, %v1426_v52   ;;  %p2268_p4 = scmp.ne.s32.totalorder %s3271_s23, %s2267_s7  ;;  %p2275_p11 = scmp.lt.s32.totalorder %s2273_s3, %s2267_s7 }
 0x1c8   : > { %1113 = vmatprep.mubr.f32.mxu0 %v2431_v0 }
 0x1c9   : > { %p2269_p3 = pnand %p2268_p4, %p3448_p2  ;;  %p2276_p12 = por %p2275_p11, %p2274_p9 }
 0x1ca   : > { %1751 = vmatmul.mubr.msk.f32.gmra.mrb[24].mxu0 %vm988_vm2, %v986_v53 }
 0x1cb   : > { %1449 = vperm.xlu0 %2125, %v1427_v54   ;;  %1454 = vperm.xlu1 %2126, %v1428_v55   ;;  %p2270_p13 = pneg %p2269_p3 }
 0x1cc   : > { %1119 = vmatprep.mubr.f32.mxu0 %v2431_v0 }
 0x1cd   : > { %p2277_p1 = pnand %p2276_p12, %p2270_p13 }
 0x1ce   : > { %1752 = vmatmul.mubr.msk.f32.gmra.mrb[26].mxu0 %vm988_vm2, %v987_v56 }
 0x1cf   : > { %1459 = vperm.xlu0 %2125, %v1429_v57   ;;  %1464 = vperm.xlu1 %2126, %v1430_v58  }
 0x1d0   : > { %1214 = vmatprep.mubr.f32.mxu0 %v2431_v0 }
 0x1d3   : > { %1469 = vperm.xlu0 %2125, %v1431_v59  }
 0x210   : > { %v1823_v60 = vpop.f32.mrb[0].mxu1 }
 0x211   : > { %v754_v61 = vpop.f32.mrb[1].mxu1  ;;  %v760_v45 = vadd.f32 %v1823_v60, %v2967_v22  ;;  %v1268_v22 = vld [vmem:[%s3444_s26 + $0x28] sm:$0xff] }
 0x212   : > { %v755_v28 = vadd.f32 %v754_v61, %v2965_v19 }
 0x213   : > { %v774_v53 = vmax.f32 %v760_v45, 0.0 }
 0x214   : > { %v1826_v62 = vpop.f32.mrb[2].mxu1  ;;  %v773_v29 = vmax.f32 %v755_v28, 0.0 }
 0x215   : > { %v764_v63 = vpop.f32.mrb[3].mxu1  ;;  %v770_v54 = vadd.f32 %v1826_v62, %v2992_v49  ;;  %v871_v49 = vsel %vm3105_vm4, %v774_v53, 0.0  ;;  %v1267_v53 = vld [vmem:[%s3444_s26 + $0x20] sm:$0xff] }
 0x216   : > { %v765_v30 = vadd.f32 %v764_v63, %v2977_v39  ;;  %v870_v61 = vsel %vm3105_vm4, %v773_v29, 0.0  ;;  %v1263_v29 = vld [vmem:[%s3444_s26] sm:$0xff] }
 0x217   : > { %v2129_v1 = vpop.permute.xlu1 %2128  ;;  %v776_v62 = vmax.f32 %v770_v54, 0.0  ;;  %v1269_v54 = vld [vmem:[%s3444_s26 + $0x30] sm:$0xff] }
 0x218   : > { %v2131_v9 = vunpack.i.h.bf16 %v2129_v1  ;;  %v2130_v10 = vunpack.i.l.bf16 %v2129_v1  ;;  %v775_v63 = vmax.f32 %v765_v30, 0.0  ;;  %v1264_v30 = vld [vmem:[%s3444_s26 + $0x8] sm:$0xff] }
 0x21a   : > { %v872_v28 = vsel %vm3105_vm4, %v775_v63, 0.0 }
 0x21b   : > { %v2134_v2 = vpop.permute.xlu1 %2133 }
 0x21c   : > { %v2136_v3 = vunpack.i.h.bf16 %v2134_v2  ;;  %v2135_v5 = vunpack.i.l.bf16 %v2134_v2 }
 0x21e   : > { %v907_v12 = vsel %vm906_vm3, %v2130_v10, %v2135_v5  ;;  %v908_v14 = vsel %vm906_vm3, %v2131_v9, %v2136_v3  ;;  %v974_v9 = vld [vmem:[%s3443_s9 + $0x10] sm:$0xff]  ;;  %v972_v10 = vld [vmem:[%s3443_s9] sm:$0xff] }
 0x21f   : > { %v1907_v33 = vpack.c.bf16 %v908_v14, %v907_v12 }
 0x225   : > { %v2139_v11 = vpop.permute.xlu0 %2138 }
 0x226   : > { %v2141_v18 = vunpack.i.h.bf16 %v2139_v11  ;;  %v2140_v20 = vunpack.i.l.bf16 %v2139_v11 }
 0x228   : > { %v935_v23 = vsel %vm906_vm3, %v2135_v5, %v2140_v20  ;;  %v936_v26 = vsel %vm906_vm3, %v2136_v3, %v2141_v18 }
 0x229   : > { %v2144_v34 = vpop.permute.xlu0 %2143  ;;  %v2149_v35 = vpop.permute.xlu1 %2148  ;;  %v1905_v38 = vpack.c.bf16 %v936_v26, %v935_v23 }
 0x22a   : > { %v2146_v41 = vunpack.i.h.bf16 %v2144_v34  ;;  %v2145_v42 = vunpack.i.l.bf16 %v2144_v34  ;;  %v2151_v43 = vunpack.i.h.bf16 %v2149_v35  ;;  %v2150_v44 = vunpack.i.l.bf16 %v2149_v35 }
 0x22b   : > { %1906 = vmatprep.subr.bf16.mxu0 %v1905_v38  ;;  %1921 = vmatprep.subr.bf16.mxu1 %v1905_v38  ;;  %v873_v35 = vsel %vm3105_vm4, %v776_v62, 0.0 }
 0x22c   : > { %1908 = vmatpush1.bf16.msra.mxu0 %v1907_v33  ;;  %1923 = vmatpush1.bf16.msra.mxu1 %v1907_v33  ;;  %v937_v47 = vsel %vm906_vm3, %v2145_v42, %v2150_v44  ;;  %v938_v48 = vsel %vm906_vm3, %v2146_v41, %v2151_v43 }
 0x22d   : > { %v2154_v19 = vpop.permute.xlu0 %2153  ;;  %v2159_v50 = vpop.permute.xlu1 %2158  ;;  %v1909_v51 = vpack.c.bf16 %v938_v48, %v937_v47  ;;  %v976_v48 = vld [vmem:[%s3443_s9 + $0x20] sm:$0xff] }
 0x22e   : > { %v2156_v40 = vunpack.i.h.bf16 %v2154_v19  ;;  %v2155_v52 = vunpack.i.l.bf16 %v2154_v19  ;;  %v2160_v55 = vunpack.i.l.bf16 %v2159_v50  ;;  %v2161_v58 = vunpack.i.h.bf16 %v2159_v50  ;;  %v977_v19 = vld [vmem:[%s3443_s9 + $0x28] sm:$0xff]  ;;  %v978_v50 = vld [vmem:[%s3443_s9 + $0x30] sm:$0xff] }
 0x22f   : > { %1910 = vmatprep.subr.bf16.mxu0 %v1909_v51  ;;  %1922 = vmatprep.subr.bf16.mxu1 %v1909_v51  ;;  %v979_v51 = vld [vmem:[%s3443_s9 + $0x38] sm:$0xff] }
 0x230   : > { %v910_v56 = vsel %vm906_vm3, %v2156_v40, %v2146_v41  ;;  %v909_v57 = vsel %vm906_vm3, %v2155_v52, %v2145_v42  ;;  %v968_v3 = vsel %vm955_vm5, %v870_v61, %v2160_v55  ;;  %v956_v14 = vsel %vm955_vm5, %v2160_v55, %v2161_v58  ;;  %v975_v41 = vld [vmem:[%s3443_s9 + $0x18] sm:$0xff]  ;;  %v973_v42 = vld [vmem:[%s3443_s9 + $0x8] sm:$0xff]  ;;  %v1265_v40 = vld [vmem:[%s3444_s26 + $0x10] sm:$0xff] }
 0x231   : > { %v1911_v59 = vpack.c.bf16 %v910_v56, %v909_v57  ;;  %v2164_v39 = vpop.permute.xlu0 %2163  ;;  %v2169_v60 = vpop.permute.xlu1 %2168  ;;  %v1266_v52 = vld [vmem:[%s3444_s26 + $0x18] sm:$0xff] }
 0x232   : > { %v2166_v1 = vunpack.i.h.bf16 %v2164_v39  ;;  %v2165_v2 = vunpack.i.l.bf16 %v2164_v39  ;;  %v2170_v5 = vunpack.i.l.bf16 %v2169_v60  ;;  %v2171_v12 = vunpack.i.h.bf16 %v2169_v60  ;;  %v1270_v55 = vld [vmem:[%s3444_s26 + $0x38] sm:$0xff] }
 0x233   : > { %1912 = vmatpush1.bf16.msra.mxu0 %v1911_v59  ;;  %1924 = vmatpush1.bf16.msra.mxu1 %v1911_v59 }
 0x234   : > { %v969_v11 = vsel %vm955_vm5, %v871_v49, %v2165_v2  ;;  %v957_v18 = vsel %vm955_vm5, %v2165_v2, %v2166_v1  ;;  %v970_v38 = vsel %vm955_vm5, %v872_v28, %v2170_v5  ;;  %v958_v44 = vsel %vm955_vm5, %v2170_v5, %v2171_v12 }
 0x235   : > { %v1915_v20 = vpack.c.bf16 %v969_v11, %v968_v3  ;;  %v2174_v23 = vpop.permute.xlu0 %2173  ;;  %v1913_v26 = vpack.c.bf16 %v957_v18, %v956_v14 }
 0x236   : > { %v2176_v33 = vunpack.i.h.bf16 %v2174_v23  ;;  %v2175_v34 = vunpack.i.l.bf16 %v2174_v23  ;;  %1755 = vmatmul.mubr.msk.f32.vlgmr.msra.gmra.mrb[4].mxu1 %vm988_vm2, %v974_v9  ;;  %1753 = vmatmul.mubr.msk.f32.vlgmr.msra.gmra.mrb[12].mxu0 %vm988_vm2, %v972_v10 }
 0x237   : > { %1914 = vmatprep.subr.bf16.mxu1 %v1913_v26  ;;  %1232 = vmatprep.mubr.f32.mxu1 %v2431_v0 }
 0x238   : > { %v971_v43 = vsel %vm955_vm5, %v873_v35, %v2175_v34  ;;  %1916 = vmatpush1.bf16.msra.mxu1 %v1915_v20  ;;  %v959_v45 = vsel %vm955_vm5, %v2175_v34, %v2176_v33  ;;  %1220 = vmatprep.mubr.f32.mxu0 %v2431_v0 }
 0x239   : > { %v1919_v46 = vpack.c.bf16 %v971_v43, %v970_v38  ;;  %v1917_v47 = vpack.c.bf16 %v959_v45, %v958_v44 }
 0x23a   : > { %1756 = vmatmul.mubr.msk.f32.gmra.mrb[6].mxu1 %vm988_vm2, %v975_v41  ;;  %1754 = vmatmul.mubr.msk.f32.gmra.mrb[14].mxu0 %vm988_vm2, %v973_v42 }
 0x23b   : > { %1918 = vmatprep.subr.bf16.mxu1 %v1917_v47  ;;  %1238 = vmatprep.mubr.f32.mxu1 %v2431_v0 }
 0x23c   : > { %1920 = vmatpush1.bf16.msra.mxu1 %v1919_v46 }
 0x23e   : > { %1757 = vmatmul.mubr.msk.f32.gmra.mrb[8].mxu1 %vm988_vm2, %v976_v48 }
 0x23f   : > { %1244 = vmatprep.mubr.f32.mxu1 %v2431_v0 }
 0x242   : > { %1758 = vmatmul.mubr.msk.f32.gmra.mrb[10].mxu1 %vm988_vm2, %v977_v19  ;;  %v1435_v14 = vpop.permute.xlu1 %1434 }
 0x243   : > { %1250 = vmatprep.mubr.f32.mxu1 %v2431_v0 }
 0x246   : > { %1759 = vmatmul.mubr.msk.f32.gmra.mrb[12].mxu1 %vm988_vm2, %v978_v50  ;;  %v1440_v35 = vpop.permute.xlu0 %1439 }
 0x247   : > { %1256 = vmatprep.mubr.f32.mxu1 %v2431_v0 }
 0x24a   : > { %1760 = vmatmul.mubr.msk.f32.gmra.mrb[14].mxu1 %vm988_vm2, %v979_v51  ;;  %v1445_v51 = vpop.permute.xlu1 %1444 }
 0x24b   : > { %1359 = vmatprep.mubr.f32.mxu1 %v2431_v0 }
 0x24e   : > { %1761 = vmatmul.mubr.msk.f32.vlgmr.msra.gmra.mrb[16].mxu1 %vm988_vm2, %v1263_v29 }
 0x24f   : > { %1365 = vmatprep.mubr.f32.mxu1 %v2431_v0 }
 0x252   : > { %1762 = vmatmul.mubr.msk.f32.gmra.mrb[18].mxu1 %vm988_vm2, %v1264_v30 }
 0x253   : > { %1371 = vmatprep.mubr.f32.mxu1 %v2431_v0 }
 0x256   : > { %1763 = vmatmul.mubr.msk.f32.gmra.mrb[4].mxu1 %vm988_vm2, %v1265_v40 }
 0x257   : > { %1377 = vmatprep.mubr.f32.mxu1 %v2431_v0 }
 0x25a   : > { %1764 = vmatmul.mubr.msk.f32.gmra.mrb[6].mxu1 %vm988_vm2, %v1266_v52 }
 0x25b   : > { %1383 = vmatprep.mubr.f32.mxu1 %v2431_v0 }
 0x25e   : > { %1765 = vmatmul.mubr.msk.f32.gmra.mrb[8].mxu1 %vm988_vm2, %v1267_v53 }
 0x25f   : > { %1389 = vmatprep.mubr.f32.mxu1 %v2431_v0 }
 0x262   : > { %1766 = vmatmul.mubr.msk.f32.gmra.mrb[10].mxu1 %vm988_vm2, %v1268_v22 }
 0x263   : > { %1395 = vmatprep.mubr.f32.mxu1 %v2431_v0 }
 0x266   : > { %1767 = vmatmul.mubr.msk.f32.gmra.mrb[12].mxu1 %vm988_vm2, %v1269_v54 }
 0x267   : > { %1401 = vmatprep.mubr.f32.mxu1 %v2431_v0 }
 0x26a   : > { %1768 = vmatmul.mubr.msk.f32.gmra.mrb[14].mxu1 %vm988_vm2, %v1270_v55 }
 0x28d   : > { %v1091_v56 = vpop.f32.mrb[16].mxu0 }
 0x28e   : > { %v1093_v57 = vpop.f32.mrb[17].mxu0 }
 0x291   : > { %v1097_v58 = vpop.f32.mrb[18].mxu0 }
 0x292   : > { %v1099_v59 = vpop.f32.mrb[19].mxu0 }
 0x295   : > { %v3206_v39 = vpop.f32.mrb[20].mxu0 }
 0x296   : > { %v3208_v60 = vpop.f32.mrb[21].mxu0 }
 0x299   : > { %v3210_v61 = vpop.f32.mrb[22].mxu0 }
 0x29a   : > { %v3212_v63 = vpop.f32.mrb[23].mxu0 }
 0x29d   : > { %v3214_v1 = vpop.f32.mrb[24].mxu0 }
 0x29e   : > { %v3216_v0 = vpop.f32.mrb[25].mxu0 }
 0x2a1   : > { %v3218_v2 = vpop.f32.mrb[26].mxu0 }
 0x2a2   : > { %v3220_v49 = vpop.f32.mrb[27].mxu0 }
 0x309   : > { %v1216_v62 = vpop.f32.mrb[12].mxu0 }
 0x30a   : > { %v1218_v3 = vpop.f32.mrb[13].mxu0 }
 0x30d   : > { %v1222_v5 = vpop.f32.mrb[14].mxu0 }
 0x30e   : > { %v1224_v9 = vpop.f32.mrb[15].mxu0 }
 0x321   : > { %v1361_v10 = vpop.f32.mrb[16].mxu1 }
 0x322   : > { %v1925_v11 = vadd.f32 %v1361_v10, %v1216_v62  ;;  %v1363_v12 = vpop.f32.mrb[17].mxu1 }
 0x323   : > { %v1926_v18 = vadd.f32 %v1363_v12, %v1218_v3 }
 0x324   : > { %v1472_v20 = vadd.f32 %v1925_v11, %v1435_v14 }
 0x325   : > { %v1473_v23 = vadd.f32 %v1926_v18, %v1435_v14  ;;  %v1367_v26 = vpop.f32.mrb[18].mxu1 }
 0x326   : > { %v1488_v28 = vmax.f32 %v1472_v20, 0.0  ;;  %v1927_v33 = vadd.f32 %v1367_v26, %v1222_v5  ;;  %v1369_v34 = vpop.f32.mrb[19].mxu1  ;;  %v1455_v26 = vpop.permute.xlu1 %1454 }
 0x327   : > { %v1489_v38 = vmax.f32 %v1473_v23, 0.0  ;;  %v1928_v41 = vadd.f32 %v1369_v34, %v1224_v9 }
 0x328   : > { %v1504_v42 = vmul.f32 0.5, %v1488_v28  ;;  %v1474_v43 = vadd.f32 %v1927_v33, %v1440_v35 }
 0x329   : > { %v1505_v44 = vmul.f32 0.5, %v1489_v38  ;;  %v1475_v45 = vadd.f32 %v1928_v41, %v1440_v35  ;;  %v1373_v46 = vpop.f32.mrb[4].mxu1 }
 0x32a   : > { %v1520_v47 = vadd.f32 %v1504_v42, %v2849_v7  ;;  %v1490_v48 = vmax.f32 %v1474_v43, 0.0  ;;  %v1929_v19 = vadd.f32 %v1373_v46, %v1091_v56  ;;  %v1375_v50 = vpop.f32.mrb[5].mxu1 }
 0x32b   : > { %v1521_v29 = vadd.f32 %v1505_v44, %v2843_v4  ;;  %v1491_v30 = vmax.f32 %v1475_v45, 0.0  ;;  %v1930_v40 = vadd.f32 %v1375_v50, %v1093_v57  ;;  %v1450_v57 = vpop.permute.xlu0 %1449 }
 0x32c   : > { %1536 = vst [vmem:[%s3226_s19] sm:$0xff] %v1520_v47  ;;  %v1506_v52 = vmul.f32 0.5, %v1490_v48  ;;  %v1476_v53 = vadd.f32 %v1929_v19, %v1445_v51 }
 0x32d   : > { %1537 = vst [vmem:[%s3226_s19 + $0x8] sm:$0xff] %v1521_v29  ;;  %v1507_v7 = vmul.f32 0.5, %v1491_v30  ;;  %v1477_v22 = vadd.f32 %v1930_v40, %v1445_v51  ;;  %v1379_v54 = vpop.f32.mrb[6].mxu1  ;;  %v1465_v29 = vpop.permute.xlu1 %1464 }
 0x32e   : > { %v1522_v55 = vadd.f32 %v1506_v52, %v2852_v8  ;;  %v1492_v56 = vmax.f32 %v1476_v53, 0.0  ;;  %v1931_v4 = vadd.f32 %v1379_v54, %v1097_v58  ;;  %v1381_v62 = vpop.f32.mrb[7].mxu1 }
 0x32f   : > { %v1523_v3 = vadd.f32 %v1507_v7, %v2846_v6  ;;  %v1493_v5 = vmax.f32 %v1477_v22, 0.0  ;;  %v1932_v9 = vadd.f32 %v1381_v62, %v1099_v59  ;;  %v1460_v44 = vpop.permute.xlu0 %1459 }
 0x330   : > { %1538 = vst [vmem:[%s3226_s19 + $0x10] sm:$0xff] %v1522_v55  ;;  %v1508_v10 = vmul.f32 0.5, %v1492_v56  ;;  %v1478_v11 = vadd.f32 %v1931_v4, %v1450_v57 }
 0x331   : > { %1539 = vst [vmem:[%s3226_s19 + $0x18] sm:$0xff] %v1523_v3  ;;  %v1509_v12 = vmul.f32 0.5, %v1493_v5  ;;  %v1479_v14 = vadd.f32 %v1932_v9, %v1450_v57  ;;  %v1385_v18 = vpop.f32.mrb[8].mxu1 }
 0x332   : > { %v1524_v20 = vadd.f32 %v1508_v10, %v2868_v16  ;;  %v1494_v8 = vmax.f32 %v1478_v11, 0.0  ;;  %v1933_v58 = vadd.f32 %v1385_v18, %v3206_v39  ;;  %v1387_v23 = vpop.f32.mrb[9].mxu1 }
 0x333   : > { %v1525_v6 = vadd.f32 %v1509_v12, %v2861_v13  ;;  %v1495_v28 = vmax.f32 %v1479_v14, 0.0  ;;  %v1934_v59 = vadd.f32 %v1387_v23, %v3208_v60  ;;  %v1470_v56 = vpop.permute.xlu0 %1469 }
 0x334   : > { %1540 = vst [vmem:[%s3226_s19 + $0x20] sm:$0xff] %v1524_v20  ;;  %v1510_v33 = vmul.f32 0.5, %v1494_v8  ;;  %v1480_v34 = vadd.f32 %v1933_v58, %v1455_v26 }
 0x335   : > { %1541 = vst [vmem:[%s3226_s19 + $0x28] sm:$0xff] %v1525_v6  ;;  %v1511_v35 = vmul.f32 0.5, %v1495_v28  ;;  %v1481_v38 = vadd.f32 %v1934_v59, %v1455_v26  ;;  %v1391_v41 = vpop.f32.mrb[10].mxu1 }
 0x336   : > { %v1526_v16 = vadd.f32 %v1510_v33, %v2871_v17  ;;  %v1496_v42 = vmax.f32 %v1480_v34, 0.0  ;;  %v1935_v39 = vadd.f32 %v1391_v41, %v3210_v61  ;;  %v1393_v43 = vpop.f32.mrb[11].mxu1 }
 0x337   : > { %v1527_v13 = vadd.f32 %v1511_v35, %v2865_v15  ;;  %v1497_v45 = vmax.f32 %v1481_v38, 0.0  ;;  %v1936_v60 = vadd.f32 %v1393_v43, %v3212_v63 }
 0x338   : > { %1542 = vst [vmem:[%s3226_s19 + $0x30] sm:$0xff] %v1526_v16  ;;  %v1512_v46 = vmul.f32 0.5, %v1496_v42  ;;  %v1482_v47 = vadd.f32 %v1935_v39, %v1460_v44 }
 0x339   : > { %1543 = vst [vmem:[%s3226_s19 + $0x38] sm:$0xff] %v1527_v13  ;;  %v1513_v48 = vmul.f32 0.5, %v1497_v45  ;;  %v1483_v17 = vadd.f32 %v1936_v60, %v1460_v44  ;;  %v1397_v19 = vpop.f32.mrb[12].mxu1 }
 0x33a   : > { %v1528_v61 = vadd.f32 %v1512_v46, %v2886_v25  ;;  %v1498_v50 = vmax.f32 %v1482_v47, 0.0  ;;  %v1937_v51 = vadd.f32 %v1397_v19, %v3214_v1  ;;  %v1399_v15 = vpop.f32.mrb[13].mxu1 }
 0x33b   : > { %v1529_v63 = vadd.f32 %v1513_v48, %v2878_v21  ;;  %v1499_v30 = vmax.f32 %v1483_v17, 0.0  ;;  %v1938_v40 = vadd.f32 %v1399_v15, %v3216_v0 }
 0x33c   : > { %1544 = vst [vmem:[%s3226_s19 + $0x40] sm:$0xff] %v1528_v61  ;;  %v1514_v52 = vmul.f32 0.5, %v1498_v50  ;;  %v1484_v53 = vadd.f32 %v1937_v51, %v1465_v29 }
 0x33d   : > { %1545 = vst [vmem:[%s3226_s19 + $0x48] sm:$0xff] %v1529_v63  ;;  %v1515_v7 = vmul.f32 0.5, %v1499_v30  ;;  %v1485_v25 = vadd.f32 %v1938_v40, %v1465_v29  ;;  %v1403_v22 = vpop.f32.mrb[14].mxu1 }
 0x33e   : > { %v1530_v1 = vadd.f32 %v1514_v52, %v2891_v27  ;;  %v1500_v54 = vmax.f32 %v1484_v53, 0.0  ;;  %v1939_v55 = vadd.f32 %v1403_v22, %v3218_v2  ;;  %v1405_v21 = vpop.f32.mrb[15].mxu1 }
 0x33f   : > { %v1531_v0 = vadd.f32 %v1515_v7, %v2883_v24  ;;  %v1501_v4 = vmax.f32 %v1485_v25, 0.0  ;;  %v1940_v62 = vadd.f32 %v1405_v21, %v3220_v49 }
 0x340   : > { %1546 = vst [vmem:[%s3226_s19 + $0x50] sm:$0xff] %v1530_v1  ;;  %v1516_v57 = vmul.f32 0.5, %v1500_v54  ;;  %v1486_v3 = vadd.f32 %v1939_v55, %v1470_v56 }
 0x341   : > { %1547 = vst [vmem:[%s3226_s19 + $0x58] sm:$0xff] %v1531_v0  ;;  %v1517_v5 = vmul.f32 0.5, %v1501_v4  ;;  %v1487_v27 = vadd.f32 %v1940_v62, %v1470_v56 }
 0x342   : > { %v1532_v2 = vadd.f32 %v1516_v57, %v2912_v36  ;;  %v1502_v9 = vmax.f32 %v1486_v3, 0.0 }
 0x343   : > { %v1533_v24 = vadd.f32 %v1517_v5, %v2898_v31  ;;  %v1503_v10 = vmax.f32 %v1487_v27, 0.0 }
 0x344   : > { %1548 = vst [vmem:[%s3226_s19 + $0x60] sm:$0xff] %v1532_v2  ;;  %v1518_v49 = vmul.f32 0.5, %v1502_v9 }
 0x345   : > { %1549 = vst [vmem:[%s3226_s19 + $0x68] sm:$0xff] %v1533_v24  ;;  %v1519_v11 = vmul.f32 0.5, %v1503_v10 }
 0x346   : > { %v1534_v12 = vadd.f32 %v1518_v49, %v2915_v37 }
 0x347   : > { %v1535_v31 = vadd.f32 %v1519_v11, %v2901_v32 }
 0x348   : > { %1550 = vst [vmem:[%s3226_s19 + $0x70] sm:$0xff] %v1534_v12 }
 0x349   : > { %1551 = vst [vmem:[%s3226_s19 + $0x78] sm:$0xff] %v1535_v31 }
 0x34a   : > { %2280 = shalt.err (!%p2277_p1)
}
 0x34b   : > { %s2281_s19 = scalar_lea.hbm %s3268_s27, 2048  ;;  %s2285_s29 = scalar_lea.hbm %s3447_s1, 8192 }
 0x34c   : > { %p2282_p5 = scmp.ne.s32.totalorder %s3268_s27, %s2281_s19  ;;  %p2286_p7 = scmp.lt.u32.totalorder %s3268_s27, %s3447_s1 }
 0x34d   : > { %p2287_p10 = scmp.lt.u32.totalorder %s2285_s29, %s2281_s19  ;;  %p2289_p4 = scmp.lt.u32.totalorder %s2281_s19, %s3268_s27 }
 0x34e   : > { %p2283_p8 = pnand %p2282_p5, %p3448_p2 }
 0x34f   : > { %p2288_p0 = por %p2287_p10, %p2286_p7 }
 0x350   : > { %p2284_p6 = pneg %p2283_p8 }
 0x351   : > { %p2290_p3 = por %p2289_p4, %p2288_p0 }
 0x353   : > { %p2291_p13 = pnand %p2290_p3, %p2284_p6 }
 0x355   : > { %2294 = shalt.err (!%p2291_p13)
}
 0x356   : > { %s2436_s7 = smov 256   ;;  %s2437_s4 = smov 512  }
 0x357   : > { %s2438_s25 = smov 16  }
 0x358   : > { %1963 = dma.vmem_to_hbm [thread:$0]  (%p3448_p2), %s3271_s23, 2048, %s3268_s27, %s1553_s8, %s2436_s7, %s2437_s4, %s2438_s25  }
 0x359 PF: > { %p1980_p9 = scmp.ge.s32.totalorder %s2421_s22, 2  ;;  %s1583_s3 = sand.u32 1, %s2393_s15  }
 0x35a   : > { %p3449_p11 = scmp.ne.s32.totalorder %s3417_s20, 0  ;;  %s1584_s19 = scalar_lea.sflag [#allocation4], %s1583_s3 }
 0x35c   : > { %p1976_p12 = pnand %p1980_p9, %p3449_p11 }
 0x35e   : > { %2364 = dma.done.wait (!%p1976_p12), %s1584_s19, 2048  }
 0x35f   : > { %2366 = vsyncadd (!%p1976_p12), %s1584_s19, 4294965248  ;;  %s28_s22 = sadd.s32 1, %s2421_s22   ;;  %s3451_s12 = sld [smem:[#allocation13_spill]] }
 0x360   : > { %p3305_p1 = scmp.ge.s32.totalorder %s28_s22, 6   ;;  %s3452_s21 = sld [smem:[#allocation21_spill]] }
 0x361   : > { %s3453_s23 = sld [smem:[#allocation14_spill]]  ;;  %s3454_s17 = sld [smem:[#allocation22_spill]] }
 0x362   : > { %s3455_s20 = sld [smem:[#allocation17_spill]]  ;;  %s3456_s19 = sld [smem:[#allocation18_spill]] }
 0x363   : > { %s3457_s27 = sld [smem:[#allocation19_spill]]  ;;  %s3458_s8 = sld [smem:[#allocation20_spill]] }
 0x364   : > { %s3460_s30 = smov %s2373_s10  ;;  %s3461_s10 = smov %s2377_s11 }
 0x365   : > { %s3462_s11 = smov %s2765_s18  ;;  %s3463_s13 = smov %s2389_s14 }
 0x366   : > { %s3464_s14 = smov %s3452_s21  ;;  %s3465_s15 = smov %s2397_s16 }
 0x367   : > { %s3466_s16 = smov %s3453_s23  ;;  %27 = sbr.rel (!%p3305_p1) target bundleno = 22 (0x16), region = 125 }
 0x368   : > { %s3467_s18 = smov %s3455_s20 }
 0x369   : > { %s3468_s20 = smov %s3457_s27  ;;  %s3469_s21 = smov %s3458_s8 }
 0x36e   :  { %1589 = vsyncpa [#allocation3], 1 }
 0x36f   :  { %1591 = vsyncpa [#allocation3 + $0x1], 1 }
 0x370   :  { %1592 = vsyncpa [#allocation6], 1 }
 0x371   :  { %1594 = vsyncpa [#allocation6 + $0x1], 1 }
 0x372   :  { %1595 = vsyncpa [#allocation4], 1 }
 0x373   :  { %1597 = vsyncpa [#allocation4 + $0x1], 1 }

</bundles_post_ra>
